<compile_context>
chip_gen: v6e
topology: v6e:2x2x1
jax: 0.10.0
libtpu: 0.0.40
codegen_flags: <defaults>
</compile_context>

<pallas_src>
import functools
import math

import jax
import jax.numpy as jnp
from jax.experimental import pallas as pl
from jax.experimental.pallas import tpu as pltpu


# ----------------------------------------------------------------------------
# Fused decoder-block kernel (one batch element per grid step)
# ----------------------------------------------------------------------------
def decoder_block_kernel(
    x_ref, enc_ref, tbias_ref, sbias_ref,
    ln0_a_ref, ln0_b_ref, wq1_ref, wk1_ref, wv1_ref, wo1_ref,
    ln1_a_ref, ln1_b_ref, wq2_ref, wk2_ref, wv2_ref, wo2_ref,
    ln2_a_ref, ln2_b_ref, w1_ref, b1_ref, w2_ref, b2_ref,
    o_ref,
    *, head_count: int, d_k: int, eps: float,
):
    x = x_ref[...].astype(jnp.float32)        # (S_tgt, D)
    enc = enc_ref[...].astype(jnp.float32)    # (S_src, D)

    def layer_norm(v, a_ref, b_ref):
        # torch .std() default: unbiased (Bessel) estimator; divide by (std+eps).
        d = v.shape[-1]
        mean = jnp.mean(v, axis=-1, keepdims=True)
        var = jnp.sum((v - mean) ** 2, axis=-1, keepdims=True) * (1.0 / (d - 1))
        std = jnp.sqrt(var)
        inv = pl.reciprocal(std + eps, approx=True)        # EUP, not VALU vdiv
        return a_ref[...] * ((v - mean) * inv) + b_ref[...]

    def mha(xq, xkv, wq_ref, wk_ref, wv_ref, wo_ref, bias):
        # bias: precomputed additive f32 mask (0 or -1e9), hoisted out of the
        # head loop (and out of the kernel entirely — computed in the wrapper).
        mm_dtype = wq_ref.dtype                # f32, or bf16 on v6e/v7x
        xq_m = xq.astype(mm_dtype)
        xkv_m = xkv.astype(mm_dtype)
        # Projections (nn.Linear bias=False); weights stored as (in, out).
        q = jnp.dot(xq_m, wq_ref[...], preferred_element_type=jnp.float32)
        q = q * (1.0 / math.sqrt(d_k))         # scale once, not per head
        k = jnp.dot(xkv_m, wk_ref[...], preferred_element_type=jnp.float32)
        v = jnp.dot(xkv_m, wv_ref[...], preferred_element_type=jnp.float32)
        # Static Python loop over heads; per-head outputs kept in registers.
        outs = []
        for h in range(head_count):
            sl = slice(h * d_k, (h + 1) * d_k)
            q_h = q[:, sl].astype(mm_dtype)
            k_h = k[:, sl].astype(mm_dtype)
            v_h = v[:, sl].astype(mm_dtype)
            # scores = q_h @ k_h^T  (contraction over d_k, no transpose op)
            s = jax.lax.dot_general(
                q_h, k_h, (((1,), (1,)), ((), ())),
                preferred_element_type=jnp.float32)          # (S_q, S_k)
            s = s + bias
            s = s - jnp.max(s, axis=-1, keepdims=True)
            p = jnp.exp(s)
            p = p * pl.reciprocal(jnp.sum(p, axis=-1, keepdims=True),
                                  approx=True)
            # TODO(synk): attention-prob dropout skipped (eval-mode forward).
            outs.append(jnp.dot(p.astype(mm_dtype), v_h,
                                preferred_element_type=jnp.float32))
        concat = jnp.concatenate(outs, axis=-1)              # (S_q, D), lane-dense
        return jnp.dot(concat.astype(mm_dtype), wo_ref[...],
                       preferred_element_type=jnp.float32)

    # Residual 0: pre-norm self-attention.
    n0 = layer_norm(x, ln0_a_ref, ln0_b_ref)
    x = x + mha(n0, n0, wq1_ref, wk1_ref, wv1_ref, wo1_ref, tbias_ref[...])

    # Residual 1: pre-norm cross-attention (keys/values = raw encoder output).
    n1 = layer_norm(x, ln1_a_ref, ln1_b_ref)
    x = x + mha(n1, enc, wq2_ref, wk2_ref, wv2_ref, wo2_ref, sbias_ref[...])

    # Residual 2: pre-norm feed-forward (relu; dropout = identity in eval).
    n2 = layer_norm(x, ln2_a_ref, ln2_b_ref)
    h = jnp.dot(n2.astype(w1_ref.dtype), w1_ref[...],
                preferred_element_type=jnp.float32) + b1_ref[...]
    h = jnp.maximum(h, 0.0)
    x = x + jnp.dot(h.astype(w2_ref.dtype), w2_ref[...],
                    preferred_element_type=jnp.float32) + b2_ref[...]

    o_ref[...] = x.astype(o_ref.dtype)


# ----------------------------------------------------------------------------
# Wrapper
# ----------------------------------------------------------------------------
def decoder_block_forward(x, enc_out, target_mask, source_mask, params,
                          *, head_count: int, eps: float = 1e-6,
                          matmul_dtype=jnp.float32):
    """x: (B, S_tgt, D), enc_out: (B, S_src, D),
    masks: (S_tgt, S_tgt) / (S_tgt, S_src) with 0 == masked.
    matmul_dtype: jnp.float32 (exact) or jnp.bfloat16 (v6e/v7x MXU fast path)."""
    B, S_tgt, D = x.shape
    S_src = enc_out.shape[1]
    d_ff = params["w1"].shape[1]
    d_k = D // head_count

    # Precompute additive f32 mask biases once (keeps int compares out of the
    # kernel / matmul path; identical softmax output to masked_fill(==0,-1e9)
    # whenever a row has at least one unmasked key).
    tbias = jnp.where(target_mask == 0, -1.0e9, 0.0).astype(jnp.float32)
    sbias = jnp.where(source_mask == 0, -1.0e9, 0.0).astype(jnp.float32)

    mm = lambda w: w.astype(matmul_dtype)      # MXU operand dtype for weights
    weight_args = [
        params["ln0_a"], params["ln0_b"],
        mm(params["wq1"]), mm(params["wk1"]), mm(params["wv1"]), mm(params["wo1"]),
        params["ln1_a"], params["ln1_b"],
        mm(params["wq2"]), mm(params["wk2"]), mm(params["wv2"]), mm(params["wo2"]),
        params["ln2_a"], params["ln2_b"],
        mm(params["w1"]), params["b1"], mm(params["w2"]), params["b2"],
    ]

    shared2d = lambda shape: pl.BlockSpec(shape, lambda b: (0, 0))

    kern = functools.partial(decoder_block_kernel,
                             head_count=head_count, d_k=d_k, eps=float(eps))

    # Explicit VMEM budget: double-buffered inputs/output + f32 intermediates.
    tensor_args = [x, enc_out, tbias, sbias] + weight_args
    in_bytes = sum(int(a.size) * a.dtype.itemsize for a in tensor_args)
    out_bytes = S_tgt * D * x.dtype.itemsize
    vmem_limit = min(2 * (in_bytes + out_bytes) + (16 << 20), 100 << 20)

    return pl.pallas_call(
        kern,
        out_shape=jax.ShapeDtypeStruct((B, S_tgt, D), x.dtype),
        grid_spec=pltpu.PrefetchScalarGridSpec(
            num_scalar_prefetch=0,
            grid=(B,),
            in_specs=[
                pl.BlockSpec((None, S_tgt, D), lambda b: (b, 0, 0)),   # x
                pl.BlockSpec((None, S_src, D), lambda b: (b, 0, 0)),   # enc_out
                shared2d((S_tgt, S_tgt)),                              # target bias
                shared2d((S_tgt, S_src)),                              # source bias
                shared2d((1, D)), shared2d((1, D)),                    # ln0 alpha/bias
                shared2d((D, D)), shared2d((D, D)),                    # wq1, wk1
                shared2d((D, D)), shared2d((D, D)),                    # wv1, wo1
                shared2d((1, D)), shared2d((1, D)),                    # ln1 alpha/bias
                shared2d((D, D)), shared2d((D, D)),                    # wq2, wk2
                shared2d((D, D)), shared2d((D, D)),                    # wv2, wo2
                shared2d((1, D)), shared2d((1, D)),                    # ln2 alpha/bias
                shared2d((D, d_ff)), shared2d((1, d_ff)),              # w1, b1
                shared2d((d_ff, D)), shared2d((1, D)),                 # w2, b2
            ],
            out_specs=pl.BlockSpec((None, S_tgt, D), lambda b: (b, 0, 0)),
        ),
        compiler_params=pltpu.CompilerParams(
            dimension_semantics=("parallel",),   # batch elements are independent
            vmem_limit_bytes=int(vmem_limit)),
    )(x, enc_out, tbias, sbias, *weight_args)


# ----------------------------------------------------------------------------
# Pure-JAX reference (mirrors the PyTorch module in eval mode)
# ----------------------------------------------------------------------------
def _ref_layernorm(x, alpha, bias, eps):
    d = x.shape[-1]
    mean = jnp.mean(x, axis=-1, keepdims=True)
    var = jnp.sum((x - mean) ** 2, axis=-1, keepdims=True) / (d - 1)
    std = jnp.sqrt(var)
    return alpha * (x - mean) / (std + eps) + bias


def _ref_mha(xq, xkv, wq, wk, wv, wo, mask, head_count):
    B, Sq, D = xq.shape
    Sk = xkv.shape[1]
    d_k = D // head_count
    q = (xq @ wq).reshape(B, Sq, head_count, d_k).transpose(0, 2, 1, 3)
    k = (xkv @ wk).reshape(B, Sk, head_count, d_k).transpose(0, 2, 1, 3)
    v = (xkv @ wv).reshape(B, Sk, head_count, d_k).transpose(0, 2, 1, 3)
    s = q @ k.transpose(0, 1, 3, 2) / math.sqrt(d_k)
    s = jnp.where(mask[None, None] == 0, -1.0e9, s)
    p = jax.nn.softmax(s, axis=-1)
    o = (p @ v).transpose(0, 2, 1, 3).reshape(B, Sq, D)
    return o @ wo


def reference_decoder_block(x, enc_out, tmask, smask, p, *, head_count, eps=1e-6):
    n0 = _ref_layernorm(x, p["ln0_a"], p["ln0_b"], eps)
    x = x + _ref_mha(n0, n0, p["wq1"], p["wk1"], p["wv1"], p["wo1"], tmask, head_count)
    n1 = _ref_layernorm(x, p["ln1_a"], p["ln1_b"], eps)
    x = x + _ref_mha(n1, enc_out, p["wq2"], p["wk2"], p["wv2"], p["wo2"], smask, head_count)
    n2 = _ref_layernorm(x, p["ln2_a"], p["ln2_b"], eps)
    h = jnp.maximum(n2 @ p["w1"] + p["b1"], 0.0)
    return x + h @ p["w2"] + p["b2"]


# ----------------------------------------------------------------------------
# Main
# ----------------------------------------------------------------------------
if __name__ == "__main__":
    # d_model = 128 so the kernel's last dim fills full 128-lane vregs
    # (lane-dense loads/stores) — per review, D=32 was lane-starved.
    B, S_tgt, S_src = 2, 8, 16
    d_model, head_count, d_ff = 128, 4, 256
    eps = 1e-6
    # dropout = 0.1 in the module; identity in eval-mode forward.

    key = jax.random.PRNGKey(0)
    ks = jax.random.split(key, 20)
    scale = 1.0 / math.sqrt(d_model)

    params = {
        "ln0_a": 1.0 + 0.1 * jax.random.normal(ks[0], (1, d_model), jnp.float32),
        "ln0_b": 0.1 * jax.random.normal(ks[1], (1, d_model), jnp.float32),
        "wq1": scale * jax.random.normal(ks[2], (d_model, d_model), jnp.float32),
        "wk1": scale * jax.random.normal(ks[3], (d_model, d_model), jnp.float32),
        "wv1": scale * jax.random.normal(ks[4], (d_model, d_model), jnp.float32),
        "wo1": scale * jax.random.normal(ks[5], (d_model, d_model), jnp.float32),
        "ln1_a": 1.0 + 0.1 * jax.random.normal(ks[6], (1, d_model), jnp.float32),
        "ln1_b": 0.1 * jax.random.normal(ks[7], (1, d_model), jnp.float32),
        "wq2": scale * jax.random.normal(ks[8], (d_model, d_model), jnp.float32),
        "wk2": scale * jax.random.normal(ks[9], (d_model, d_model), jnp.float32),
        "wv2": scale * jax.random.normal(ks[10], (d_model, d_model), jnp.float32),
        "wo2": scale * jax.random.normal(ks[11], (d_model, d_model), jnp.float32),
        "ln2_a": 1.0 + 0.1 * jax.random.normal(ks[12], (1, d_model), jnp.float32),
        "ln2_b": 0.1 * jax.random.normal(ks[13], (1, d_model), jnp.float32),
        "w1": scale * jax.random.normal(ks[14], (d_model, d_ff), jnp.float32),
        "b1": 0.1 * jax.random.normal(ks[15], (1, d_ff), jnp.float32),
        "w2": (1.0 / math.sqrt(d_ff)) * jax.random.normal(ks[16], (d_ff, d_model), jnp.float32),
        "b2": 0.1 * jax.random.normal(ks[17], (1, d_model), jnp.float32),
    }

    x = jax.random.normal(ks[18], (B, S_tgt, d_model), jnp.float32)
    enc_out = jax.random.normal(ks[19], (B, S_src, d_model), jnp.float32)

    # Causal target mask; source mask with a few padded encoder positions.
    target_mask = jnp.tril(jnp.ones((S_tgt, S_tgt), jnp.int32))
    source_mask = jnp.ones((S_tgt, S_src), jnp.int32).at[:, -3:].set(0)

    # matmul_dtype=jnp.float32 keeps exact module numerics; on v6e/v7x set
    # matmul_dtype=jnp.bfloat16 for 2x MXU throughput / half the weight DMA.
    out = decoder_block_forward(x, enc_out, target_mask, source_mask, params,
                                head_count=head_count, eps=eps,
                                matmul_dtype=jnp.float32)
    out = jax.block_until_ready(out)

    ref = reference_decoder_block(x, enc_out, target_mask, source_mask, params,
                                  head_count=head_count, eps=eps)
    ref = jax.block_until_ready(ref)

    assert out.shape == (B, S_tgt, d_model)
    assert bool(jnp.all(jnp.isfinite(out)))
    assert jnp.allclose(out, ref, atol=2e-2, rtol=2e-2), "decoder block mismatch vs reference"

    print("KERNEL_OK")
</pallas_src>

<mosaic_0001>
module attributes {stable_mosaic.version = 11 : i64} {
  func.func @decoder_block_kernel(%arg0: i32, %arg1: memref<1x8x128xf32, #tpu.memory_space<vmem>>, %arg2: memref<1x16x128xf32, #tpu.memory_space<vmem>>, %arg3: memref<8x8xf32, #tpu.memory_space<vmem>>, %arg4: memref<8x16xf32, #tpu.memory_space<vmem>>, %arg5: memref<1x128xf32, #tpu.memory_space<vmem>>, %arg6: memref<1x128xf32, #tpu.memory_space<vmem>>, %arg7: memref<128x128xf32, #tpu.memory_space<vmem>>, %arg8: memref<128x128xf32, #tpu.memory_space<vmem>>, %arg9: memref<128x128xf32, #tpu.memory_space<vmem>>, %arg10: memref<128x128xf32, #tpu.memory_space<vmem>>, %arg11: memref<1x128xf32, #tpu.memory_space<vmem>>, %arg12: memref<1x128xf32, #tpu.memory_space<vmem>>, %arg13: memref<128x128xf32, #tpu.memory_space<vmem>>, %arg14: memref<128x128xf32, #tpu.memory_space<vmem>>, %arg15: memref<128x128xf32, #tpu.memory_space<vmem>>, %arg16: memref<128x128xf32, #tpu.memory_space<vmem>>, %arg17: memref<1x128xf32, #tpu.memory_space<vmem>>, %arg18: memref<1x128xf32, #tpu.memory_space<vmem>>, %arg19: memref<128x256xf32, #tpu.memory_space<vmem>>, %arg20: memref<1x256xf32, #tpu.memory_space<vmem>>, %arg21: memref<256x128xf32, #tpu.memory_space<vmem>>, %arg22: memref<1x128xf32, #tpu.memory_space<vmem>>, %arg23: memref<1x8x128xf32, #tpu.memory_space<vmem>>) attributes {dimension_semantics = [#tpu.dimension_semantics<parallel>], iteration_bounds = array<i64: 2>, scalar_prefetch = 0 : i64, scratch_operands = 0 : i64, tpu.core_type = #tpu.core_type<tc>, window_params = [{transform_indices = @transform_0, window_bounds = array<i64: 1, 8, 128>}, {transform_indices = @transform_1, window_bounds = array<i64: 1, 16, 128>}, {pipeline_mode = #tpu.pipeline_mode<synchronous>, transform_indices = @transform_2, window_bounds = array<i64: 8, 8>}, {pipeline_mode = #tpu.pipeline_mode<synchronous>, transform_indices = @transform_3, window_bounds = array<i64: 8, 16>}, {pipeline_mode = #tpu.pipeline_mode<synchronous>, transform_indices = @transform_4, window_bounds = array<i64: 1, 128>}, {pipeline_mode = #tpu.pipeline_mode<synchronous>, transform_indices = @transform_5, window_bounds = array<i64: 1, 128>}, {pipeline_mode = #tpu.pipeline_mode<synchronous>, transform_indices = @transform_6, window_bounds = array<i64: 128, 128>}, {pipeline_mode = #tpu.pipeline_mode<synchronous>, transform_indices = @transform_7, window_bounds = array<i64: 128, 128>}, {pipeline_mode = #tpu.pipeline_mode<synchronous>, transform_indices = @transform_8, window_bounds = array<i64: 128, 128>}, {pipeline_mode = #tpu.pipeline_mode<synchronous>, transform_indices = @transform_9, window_bounds = array<i64: 128, 128>}, {pipeline_mode = #tpu.pipeline_mode<synchronous>, transform_indices = @transform_10, window_bounds = array<i64: 1, 128>}, {pipeline_mode = #tpu.pipeline_mode<synchronous>, transform_indices = @transform_11, window_bounds = array<i64: 1, 128>}, {pipeline_mode = #tpu.pipeline_mode<synchronous>, transform_indices = @transform_12, window_bounds = array<i64: 128, 128>}, {pipeline_mode = #tpu.pipeline_mode<synchronous>, transform_indices = @transform_13, window_bounds = array<i64: 128, 128>}, {pipeline_mode = #tpu.pipeline_mode<synchronous>, transform_indices = @transform_14, window_bounds = array<i64: 128, 128>}, {pipeline_mode = #tpu.pipeline_mode<synchronous>, transform_indices = @transform_15, window_bounds = array<i64: 128, 128>}, {pipeline_mode = #tpu.pipeline_mode<synchronous>, transform_indices = @transform_16, window_bounds = array<i64: 1, 128>}, {pipeline_mode = #tpu.pipeline_mode<synchronous>, transform_indices = @transform_17, window_bounds = array<i64: 1, 128>}, {pipeline_mode = #tpu.pipeline_mode<synchronous>, transform_indices = @transform_18, window_bounds = array<i64: 128, 256>}, {pipeline_mode = #tpu.pipeline_mode<synchronous>, transform_indices = @transform_19, window_bounds = array<i64: 1, 256>}, {pipeline_mode = #tpu.pipeline_mode<synchronous>, transform_indices = @transform_20, window_bounds = array<i64: 256, 128>}, {pipeline_mode = #tpu.pipeline_mode<synchronous>, transform_indices = @transform_21, window_bounds = array<i64: 1, 128>}, {transform_indices = @transform_22, window_bounds = array<i64: 1, 8, 128>}]} {
    %c0 = arith.constant 0 : index
    %c0_0 = arith.constant 0 : index
    %c0_1 = arith.constant 0 : index
    %0 = vector.load %arg1[%c0, %c0_0, %c0_1] : memref<1x8x128xf32, #tpu.memory_space<vmem>>, vector<1x8x128xf32>
    %1 = vector.shape_cast %0 : vector<1x8x128xf32> to vector<8x128xf32>
    %c0_2 = arith.constant 0 : index
    %c0_3 = arith.constant 0 : index
    %c0_4 = arith.constant 0 : index
    %2 = vector.load %arg2[%c0_2, %c0_3, %c0_4] : memref<1x16x128xf32, #tpu.memory_space<vmem>>, vector<1x16x128xf32>
    %3 = vector.shape_cast %2 : vector<1x16x128xf32> to vector<16x128xf32>
    %cst = arith.constant dense<0.000000e+00> : vector<8xf32>
    %4 = vector.multi_reduction <add>, %1, %cst [1] : vector<8x128xf32> to vector<8xf32>
    %5 = vector.shape_cast %4 : vector<8xf32> to vector<8x1xf32>
    %cst_5 = arith.constant 1.280000e+02 : f32
    %6 = vector.broadcast %cst_5 : f32 to vector<8x1xf32>
    %7 = arith.divf %5, %6 : vector<8x1xf32>
    %8 = vector.broadcast %7 : vector<8x1xf32> to vector<8x128xf32>
    %9 = arith.subf %1, %8 : vector<8x128xf32>
    %10 = arith.mulf %9, %9 : vector<8x128xf32>
    %cst_6 = arith.constant dense<0.000000e+00> : vector<8xf32>
    %11 = vector.multi_reduction <add>, %10, %cst_6 [1] : vector<8x128xf32> to vector<8xf32>
    %12 = vector.shape_cast %11 : vector<8xf32> to vector<8x1xf32>
    %cst_7 = arith.constant 0.00787401571 : f32
    %13 = vector.broadcast %cst_7 : f32 to vector<8x1xf32>
    %14 = arith.mulf %12, %13 : vector<8x1xf32>
    %15 = math.sqrt %14 : vector<8x1xf32>
    %cst_8 = arith.constant 9.99999997E-7 : f32
    %16 = vector.broadcast %cst_8 : f32 to vector<8x1xf32>
    %17 = arith.addf %15, %16 : vector<8x1xf32>
    %18 = tpu.reciprocal %17 {approx = true} : vector<8x1xf32> -> vector<8x1xf32>
    %c0_9 = arith.constant 0 : index
    %c0_10 = arith.constant 0 : index
    %19 = vector.load %arg5[%c0_9, %c0_10] : memref<1x128xf32, #tpu.memory_space<vmem>>, vector<1x128xf32>
    %20 = vector.broadcast %7 : vector<8x1xf32> to vector<8x128xf32>
    %21 = arith.subf %1, %20 : vector<8x128xf32>
    %22 = vector.broadcast %18 : vector<8x1xf32> to vector<8x128xf32>
    %23 = arith.mulf %21, %22 : vector<8x128xf32>
    %24 = vector.broadcast %19 : vector<1x128xf32> to vector<8x128xf32>
    %25 = arith.mulf %24, %23 : vector<8x128xf32>
    %c0_11 = arith.constant 0 : index
    %c0_12 = arith.constant 0 : index
    %26 = vector.load %arg6[%c0_11, %c0_12] : memref<1x128xf32, #tpu.memory_space<vmem>>, vector<1x128xf32>
    %27 = vector.broadcast %26 : vector<1x128xf32> to vector<8x128xf32>
    %28 = arith.addf %25, %27 : vector<8x128xf32>
    %c0_13 = arith.constant 0 : index
    %c0_14 = arith.constant 0 : index
    %29 = vector.load %arg3[%c0_13, %c0_14] : memref<8x8xf32, #tpu.memory_space<vmem>>, vector<8x8xf32>
    %c0_15 = arith.constant 0 : index
    %c0_16 = arith.constant 0 : index
    %30 = vector.load %arg7[%c0_15, %c0_16] : memref<128x128xf32, #tpu.memory_space<vmem>>, vector<128x128xf32>
    %cst_17 = arith.constant dense<0.000000e+00> : vector<8x128xf32>
    %31 = tpu.matmul %28, %30, %cst_17 {dimension_numbers = #tpu.dot_dimension_numbers<[1], [0], [0], [1], [0, 0, 1, 1], [], []>} : vector<8x128xf32>, vector<128x128xf32>, vector<8x128xf32> -> vector<8x128xf32>
    %cst_18 = arith.constant 0.176776692 : f32
    %32 = vector.broadcast %cst_18 : f32 to vector<8x128xf32>
    %33 = arith.mulf %31, %32 : vector<8x128xf32>
    %c0_19 = arith.constant 0 : index
    %c0_20 = arith.constant 0 : index
    %34 = vector.load %arg8[%c0_19, %c0_20] : memref<128x128xf32, #tpu.memory_space<vmem>>, vector<128x128xf32>
    %cst_21 = arith.constant dense<0.000000e+00> : vector<8x128xf32>
    %35 = tpu.matmul %28, %34, %cst_21 {dimension_numbers = #tpu.dot_dimension_numbers<[1], [0], [0], [1], [0, 0, 1, 1], [], []>} : vector<8x128xf32>, vector<128x128xf32>, vector<8x128xf32> -> vector<8x128xf32>
    %c0_22 = arith.constant 0 : index
    %c0_23 = arith.constant 0 : index
    %36 = vector.load %arg9[%c0_22, %c0_23] : memref<128x128xf32, #tpu.memory_space<vmem>>, vector<128x128xf32>
    %cst_24 = arith.constant dense<0.000000e+00> : vector<8x128xf32>
    %37 = tpu.matmul %28, %36, %cst_24 {dimension_numbers = #tpu.dot_dimension_numbers<[1], [0], [0], [1], [0, 0, 1, 1], [], []>} : vector<8x128xf32>, vector<128x128xf32>, vector<8x128xf32> -> vector<8x128xf32>
    %38 = vector.extract_strided_slice %33 {offsets = [0, 0], sizes = [8, 32], strides = [1, 1]} : vector<8x128xf32> to vector<8x32xf32>
    %39 = vector.extract_strided_slice %35 {offsets = [0, 0], sizes = [8, 32], strides = [1, 1]} : vector<8x128xf32> to vector<8x32xf32>
    %40 = vector.extract_strided_slice %37 {offsets = [0, 0], sizes = [8, 32], strides = [1, 1]} : vector<8x128xf32> to vector<8x32xf32>
    %cst_25 = arith.constant dense<0.000000e+00> : vector<8x8xf32>
    %41 = tpu.matmul %38, %39, %cst_25 {dimension_numbers = #tpu.dot_dimension_numbers<[1], [1], [0], [0], [0, 0, 1, 0], [], []>} : vector<8x32xf32>, vector<8x32xf32>, vector<8x8xf32> -> vector<8x8xf32>
    %42 = arith.addf %41, %29 : vector<8x8xf32>
    %cst_26 = arith.constant dense<0xFF800000> : vector<8xf32>
    %43 = vector.multi_reduction <maximumf>, %42, %cst_26 [1] : vector<8x8xf32> to vector<8xf32>
    %44 = vector.shape_cast %43 : vector<8xf32> to vector<8x1xf32>
    %45 = vector.broadcast %44 : vector<8x1xf32> to vector<8x8xf32>
    %46 = arith.subf %42, %45 : vector<8x8xf32>
    %47 = math.exp %46 : vector<8x8xf32>
    %cst_27 = arith.constant dense<0.000000e+00> : vector<8xf32>
    %48 = vector.multi_reduction <add>, %47, %cst_27 [1] : vector<8x8xf32> to vector<8xf32>
    %49 = vector.shape_cast %48 : vector<8xf32> to vector<8x1xf32>
    %50 = tpu.reciprocal %49 {approx = true} : vector<8x1xf32> -> vector<8x1xf32>
    %51 = vector.broadcast %50 : vector<8x1xf32> to vector<8x8xf32>
    %52 = arith.mulf %47, %51 : vector<8x8xf32>
    %cst_28 = arith.constant dense<0.000000e+00> : vector<8x32xf32>
    %53 = tpu.matmul %52, %40, %cst_28 {dimension_numbers = #tpu.dot_dimension_numbers<[1], [0], [0], [1], [0, 0, 1, 1], [], []>} : vector<8x8xf32>, vector<8x32xf32>, vector<8x32xf32> -> vector<8x32xf32>
    %54 = vector.extract_strided_slice %33 {offsets = [0, 32], sizes = [8, 32], strides = [1, 1]} : vector<8x128xf32> to vector<8x32xf32>
    %55 = vector.extract_strided_slice %35 {offsets = [0, 32], sizes = [8, 32], strides = [1, 1]} : vector<8x128xf32> to vector<8x32xf32>
    %56 = vector.extract_strided_slice %37 {offsets = [0, 32], sizes = [8, 32], strides = [1, 1]} : vector<8x128xf32> to vector<8x32xf32>
    %cst_29 = arith.constant dense<0.000000e+00> : vector<8x8xf32>
    %57 = tpu.matmul %54, %55, %cst_29 {dimension_numbers = #tpu.dot_dimension_numbers<[1], [1], [0], [0], [0, 0, 1, 0], [], []>} : vector<8x32xf32>, vector<8x32xf32>, vector<8x8xf32> -> vector<8x8xf32>
    %58 = arith.addf %57, %29 : vector<8x8xf32>
    %cst_30 = arith.constant dense<0xFF800000> : vector<8xf32>
    %59 = vector.multi_reduction <maximumf>, %58, %cst_30 [1] : vector<8x8xf32> to vector<8xf32>
    %60 = vector.shape_cast %59 : vector<8xf32> to vector<8x1xf32>
    %61 = vector.broadcast %60 : vector<8x1xf32> to vector<8x8xf32>
    %62 = arith.subf %58, %61 : vector<8x8xf32>
    %63 = math.exp %62 : vector<8x8xf32>
    %cst_31 = arith.constant dense<0.000000e+00> : vector<8xf32>
    %64 = vector.multi_reduction <add>, %63, %cst_31 [1] : vector<8x8xf32> to vector<8xf32>
    %65 = vector.shape_cast %64 : vector<8xf32> to vector<8x1xf32>
    %66 = tpu.reciprocal %65 {approx = true} : vector<8x1xf32> -> vector<8x1xf32>
    %67 = vector.broadcast %66 : vector<8x1xf32> to vector<8x8xf32>
    %68 = arith.mulf %63, %67 : vector<8x8xf32>
    %cst_32 = arith.constant dense<0.000000e+00> : vector<8x32xf32>
    %69 = tpu.matmul %68, %56, %cst_32 {dimension_numbers = #tpu.dot_dimension_numbers<[1], [0], [0], [1], [0, 0, 1, 1], [], []>} : vector<8x8xf32>, vector<8x32xf32>, vector<8x32xf32> -> vector<8x32xf32>
    %70 = vector.extract_strided_slice %33 {offsets = [0, 64], sizes = [8, 32], strides = [1, 1]} : vector<8x128xf32> to vector<8x32xf32>
    %71 = vector.extract_strided_slice %35 {offsets = [0, 64], sizes = [8, 32], strides = [1, 1]} : vector<8x128xf32> to vector<8x32xf32>
    %72 = vector.extract_strided_slice %37 {offsets = [0, 64], sizes = [8, 32], strides = [1, 1]} : vector<8x128xf32> to vector<8x32xf32>
    %cst_33 = arith.constant dense<0.000000e+00> : vector<8x8xf32>
    %73 = tpu.matmul %70, %71, %cst_33 {dimension_numbers = #tpu.dot_dimension_numbers<[1], [1], [0], [0], [0, 0, 1, 0], [], []>} : vector<8x32xf32>, vector<8x32xf32>, vector<8x8xf32> -> vector<8x8xf32>
    %74 = arith.addf %73, %29 : vector<8x8xf32>
    %cst_34 = arith.constant dense<0xFF800000> : vector<8xf32>
    %75 = vector.multi_reduction <maximumf>, %74, %cst_34 [1] : vector<8x8xf32> to vector<8xf32>
    %76 = vector.shape_cast %75 : vector<8xf32> to vector<8x1xf32>
    %77 = vector.broadcast %76 : vector<8x1xf32> to vector<8x8xf32>
    %78 = arith.subf %74, %77 : vector<8x8xf32>
    %79 = math.exp %78 : vector<8x8xf32>
    %cst_35 = arith.constant dense<0.000000e+00> : vector<8xf32>
    %80 = vector.multi_reduction <add>, %79, %cst_35 [1] : vector<8x8xf32> to vector<8xf32>
    %81 = vector.shape_cast %80 : vector<8xf32> to vector<8x1xf32>
    %82 = tpu.reciprocal %81 {approx = true} : vector<8x1xf32> -> vector<8x1xf32>
    %83 = vector.broadcast %82 : vector<8x1xf32> to vector<8x8xf32>
    %84 = arith.mulf %79, %83 : vector<8x8xf32>
    %cst_36 = arith.constant dense<0.000000e+00> : vector<8x32xf32>
    %85 = tpu.matmul %84, %72, %cst_36 {dimension_numbers = #tpu.dot_dimension_numbers<[1], [0], [0], [1], [0, 0, 1, 1], [], []>} : vector<8x8xf32>, vector<8x32xf32>, vector<8x32xf32> -> vector<8x32xf32>
    %86 = vector.extract_strided_slice %33 {offsets = [0, 96], sizes = [8, 32], strides = [1, 1]} : vector<8x128xf32> to vector<8x32xf32>
    %87 = vector.extract_strided_slice %35 {offsets = [0, 96], sizes = [8, 32], strides = [1, 1]} : vector<8x128xf32> to vector<8x32xf32>
    %88 = vector.extract_strided_slice %37 {offsets = [0, 96], sizes = [8, 32], strides = [1, 1]} : vector<8x128xf32> to vector<8x32xf32>
    %cst_37 = arith.constant dense<0.000000e+00> : vector<8x8xf32>
    %89 = tpu.matmul %86, %87, %cst_37 {dimension_numbers = #tpu.dot_dimension_numbers<[1], [1], [0], [0], [0, 0, 1, 0], [], []>} : vector<8x32xf32>, vector<8x32xf32>, vector<8x8xf32> -> vector<8x8xf32>
    %90 = arith.addf %89, %29 : vector<8x8xf32>
    %cst_38 = arith.constant dense<0xFF800000> : vector<8xf32>
    %91 = vector.multi_reduction <maximumf>, %90, %cst_38 [1] : vector<8x8xf32> to vector<8xf32>
    %92 = vector.shape_cast %91 : vector<8xf32> to vector<8x1xf32>
    %93 = vector.broadcast %92 : vector<8x1xf32> to vector<8x8xf32>
    %94 = arith.subf %90, %93 : vector<8x8xf32>
    %95 = math.exp %94 : vector<8x8xf32>
    %cst_39 = arith.constant dense<0.000000e+00> : vector<8xf32>
    %96 = vector.multi_reduction <add>, %95, %cst_39 [1] : vector<8x8xf32> to vector<8xf32>
    %97 = vector.shape_cast %96 : vector<8xf32> to vector<8x1xf32>
    %98 = tpu.reciprocal %97 {approx = true} : vector<8x1xf32> -> vector<8x1xf32>
    %99 = vector.broadcast %98 : vector<8x1xf32> to vector<8x8xf32>
    %100 = arith.mulf %95, %99 : vector<8x8xf32>
    %cst_40 = arith.constant dense<0.000000e+00> : vector<8x32xf32>
    %101 = tpu.matmul %100, %88, %cst_40 {dimension_numbers = #tpu.dot_dimension_numbers<[1], [0], [0], [1], [0, 0, 1, 1], [], []>} : vector<8x8xf32>, vector<8x32xf32>, vector<8x32xf32> -> vector<8x32xf32>
    %102 = tpu.concatenate %53, %69, %85, %101 in 1 : vector<8x32xf32>, vector<8x32xf32>, vector<8x32xf32>, vector<8x32xf32> -> vector<8x128xf32>
    %c0_41 = arith.constant 0 : index
    %c0_42 = arith.constant 0 : index
    %103 = vector.load %arg10[%c0_41, %c0_42] : memref<128x128xf32, #tpu.memory_space<vmem>>, vector<128x128xf32>
    %cst_43 = arith.constant dense<0.000000e+00> : vector<8x128xf32>
    %104 = tpu.matmul %102, %103, %cst_43 {dimension_numbers = #tpu.dot_dimension_numbers<[1], [0], [0], [1], [0, 0, 1, 1], [], []>} : vector<8x128xf32>, vector<128x128xf32>, vector<8x128xf32> -> vector<8x128xf32>
    %105 = arith.addf %1, %104 : vector<8x128xf32>
    %cst_44 = arith.constant dense<0.000000e+00> : vector<8xf32>
    %106 = vector.multi_reduction <add>, %105, %cst_44 [1] : vector<8x128xf32> to vector<8xf32>
    %107 = vector.shape_cast %106 : vector<8xf32> to vector<8x1xf32>
    %cst_45 = arith.constant 1.280000e+02 : f32
    %108 = vector.broadcast %cst_45 : f32 to vector<8x1xf32>
    %109 = arith.divf %107, %108 : vector<8x1xf32>
    %110 = vector.broadcast %109 : vector<8x1xf32> to vector<8x128xf32>
    %111 = arith.subf %105, %110 : vector<8x128xf32>
    %112 = arith.mulf %111, %111 : vector<8x128xf32>
    %cst_46 = arith.constant dense<0.000000e+00> : vector<8xf32>
    %113 = vector.multi_reduction <add>, %112, %cst_46 [1] : vector<8x128xf32> to vector<8xf32>
    %114 = vector.shape_cast %113 : vector<8xf32> to vector<8x1xf32>
    %cst_47 = arith.constant 0.00787401571 : f32
    %115 = vector.broadcast %cst_47 : f32 to vector<8x1xf32>
    %116 = arith.mulf %114, %115 : vector<8x1xf32>
    %117 = math.sqrt %116 : vector<8x1xf32>
    %cst_48 = arith.constant 9.99999997E-7 : f32
    %118 = vector.broadcast %cst_48 : f32 to vector<8x1xf32>
    %119 = arith.addf %117, %118 : vector<8x1xf32>
    %120 = tpu.reciprocal %119 {approx = true} : vector<8x1xf32> -> vector<8x1xf32>
    %c0_49 = arith.constant 0 : index
    %c0_50 = arith.constant 0 : index
    %121 = vector.load %arg11[%c0_49, %c0_50] : memref<1x128xf32, #tpu.memory_space<vmem>>, vector<1x128xf32>
    %122 = vector.broadcast %109 : vector<8x1xf32> to vector<8x128xf32>
    %123 = arith.subf %105, %122 : vector<8x128xf32>
    %124 = vector.broadcast %120 : vector<8x1xf32> to vector<8x128xf32>
    %125 = arith.mulf %123, %124 : vector<8x128xf32>
    %126 = vector.broadcast %121 : vector<1x128xf32> to vector<8x128xf32>
    %127 = arith.mulf %126, %125 : vector<8x128xf32>
    %c0_51 = arith.constant 0 : index
    %c0_52 = arith.constant 0 : index
    %128 = vector.load %arg12[%c0_51, %c0_52] : memref<1x128xf32, #tpu.memory_space<vmem>>, vector<1x128xf32>
    %129 = vector.broadcast %128 : vector<1x128xf32> to vector<8x128xf32>
    %130 = arith.addf %127, %129 : vector<8x128xf32>
    %c0_53 = arith.constant 0 : index
    %c0_54 = arith.constant 0 : index
    %131 = vector.load %arg4[%c0_53, %c0_54] : memref<8x16xf32, #tpu.memory_space<vmem>>, vector<8x16xf32>
    %c0_55 = arith.constant 0 : index
    %c0_56 = arith.constant 0 : index
    %132 = vector.load %arg13[%c0_55, %c0_56] : memref<128x128xf32, #tpu.memory_space<vmem>>, vector<128x128xf32>
    %cst_57 = arith.constant dense<0.000000e+00> : vector<8x128xf32>
    %133 = tpu.matmul %130, %132, %cst_57 {dimension_numbers = #tpu.dot_dimension_numbers<[1], [0], [0], [1], [0, 0, 1, 1], [], []>} : vector<8x128xf32>, vector<128x128xf32>, vector<8x128xf32> -> vector<8x128xf32>
    %cst_58 = arith.constant 0.176776692 : f32
    %134 = vector.broadcast %cst_58 : f32 to vector<8x128xf32>
    %135 = arith.mulf %133, %134 : vector<8x128xf32>
    %c0_59 = arith.constant 0 : index
    %c0_60 = arith.constant 0 : index
    %136 = vector.load %arg14[%c0_59, %c0_60] : memref<128x128xf32, #tpu.memory_space<vmem>>, vector<128x128xf32>
    %cst_61 = arith.constant dense<0.000000e+00> : vector<16x128xf32>
    %137 = tpu.matmul %3, %136, %cst_61 {dimension_numbers = #tpu.dot_dimension_numbers<[1], [0], [0], [1], [0, 0, 1, 1], [], []>} : vector<16x128xf32>, vector<128x128xf32>, vector<16x128xf32> -> vector<16x128xf32>
    %c0_62 = arith.constant 0 : index
    %c0_63 = arith.constant 0 : index
    %138 = vector.load %arg15[%c0_62, %c0_63] : memref<128x128xf32, #tpu.memory_space<vmem>>, vector<128x128xf32>
    %cst_64 = arith.constant dense<0.000000e+00> : vector<16x128xf32>
    %139 = tpu.matmul %3, %138, %cst_64 {dimension_numbers = #tpu.dot_dimension_numbers<[1], [0], [0], [1], [0, 0, 1, 1], [], []>} : vector<16x128xf32>, vector<128x128xf32>, vector<16x128xf32> -> vector<16x128xf32>
    %140 = vector.extract_strided_slice %135 {offsets = [0, 0], sizes = [8, 32], strides = [1, 1]} : vector<8x128xf32> to vector<8x32xf32>
    %141 = vector.extract_strided_slice %137 {offsets = [0, 0], sizes = [16, 32], strides = [1, 1]} : vector<16x128xf32> to vector<16x32xf32>
    %142 = vector.extract_strided_slice %139 {offsets = [0, 0], sizes = [16, 32], strides = [1, 1]} : vector<16x128xf32> to vector<16x32xf32>
    %cst_65 = arith.constant dense<0.000000e+00> : vector<8x16xf32>
    %143 = tpu.matmul %140, %141, %cst_65 {dimension_numbers = #tpu.dot_dimension_numbers<[1], [1], [0], [0], [0, 0, 1, 0], [], []>} : vector<8x32xf32>, vector<16x32xf32>, vector<8x16xf32> -> vector<8x16xf32>
    %144 = arith.addf %143, %131 : vector<8x16xf32>
    %cst_66 = arith.constant dense<0xFF800000> : vector<8xf32>
    %145 = vector.multi_reduction <maximumf>, %144, %cst_66 [1] : vector<8x16xf32> to vector<8xf32>
    %146 = vector.shape_cast %145 : vector<8xf32> to vector<8x1xf32>
    %147 = vector.broadcast %146 : vector<8x1xf32> to vector<8x16xf32>
    %148 = arith.subf %144, %147 : vector<8x16xf32>
    %149 = math.exp %148 : vector<8x16xf32>
    %cst_67 = arith.constant dense<0.000000e+00> : vector<8xf32>
    %150 = vector.multi_reduction <add>, %149, %cst_67 [1] : vector<8x16xf32> to vector<8xf32>
    %151 = vector.shape_cast %150 : vector<8xf32> to vector<8x1xf32>
    %152 = tpu.reciprocal %151 {approx = true} : vector<8x1xf32> -> vector<8x1xf32>
    %153 = vector.broadcast %152 : vector<8x1xf32> to vector<8x16xf32>
    %154 = arith.mulf %149, %153 : vector<8x16xf32>
    %cst_68 = arith.constant dense<0.000000e+00> : vector<8x32xf32>
    %155 = tpu.matmul %154, %142, %cst_68 {dimension_numbers = #tpu.dot_dimension_numbers<[1], [0], [0], [1], [0, 0, 1, 1], [], []>} : vector<8x16xf32>, vector<16x32xf32>, vector<8x32xf32> -> vector<8x32xf32>
    %156 = vector.extract_strided_slice %135 {offsets = [0, 32], sizes = [8, 32], strides = [1, 1]} : vector<8x128xf32> to vector<8x32xf32>
    %157 = vector.extract_strided_slice %137 {offsets = [0, 32], sizes = [16, 32], strides = [1, 1]} : vector<16x128xf32> to vector<16x32xf32>
    %158 = vector.extract_strided_slice %139 {offsets = [0, 32], sizes = [16, 32], strides = [1, 1]} : vector<16x128xf32> to vector<16x32xf32>
    %cst_69 = arith.constant dense<0.000000e+00> : vector<8x16xf32>
    %159 = tpu.matmul %156, %157, %cst_69 {dimension_numbers = #tpu.dot_dimension_numbers<[1], [1], [0], [0], [0, 0, 1, 0], [], []>} : vector<8x32xf32>, vector<16x32xf32>, vector<8x16xf32> -> vector<8x16xf32>
    %160 = arith.addf %159, %131 : vector<8x16xf32>
    %cst_70 = arith.constant dense<0xFF800000> : vector<8xf32>
    %161 = vector.multi_reduction <maximumf>, %160, %cst_70 [1] : vector<8x16xf32> to vector<8xf32>
    %162 = vector.shape_cast %161 : vector<8xf32> to vector<8x1xf32>
    %163 = vector.broadcast %162 : vector<8x1xf32> to vector<8x16xf32>
    %164 = arith.subf %160, %163 : vector<8x16xf32>
    %165 = math.exp %164 : vector<8x16xf32>
    %cst_71 = arith.constant dense<0.000000e+00> : vector<8xf32>
    %166 = vector.multi_reduction <add>, %165, %cst_71 [1] : vector<8x16xf32> to vector<8xf32>
    %167 = vector.shape_cast %166 : vector<8xf32> to vector<8x1xf32>
    %168 = tpu.reciprocal %167 {approx = true} : vector<8x1xf32> -> vector<8x1xf32>
    %169 = vector.broadcast %168 : vector<8x1xf32> to vector<8x16xf32>
    %170 = arith.mulf %165, %169 : vector<8x16xf32>
    %cst_72 = arith.constant dense<0.000000e+00> : vector<8x32xf32>
    %171 = tpu.matmul %170, %158, %cst_72 {dimension_numbers = #tpu.dot_dimension_numbers<[1], [0], [0], [1], [0, 0, 1, 1], [], []>} : vector<8x16xf32>, vector<16x32xf32>, vector<8x32xf32> -> vector<8x32xf32>
    %172 = vector.extract_strided_slice %135 {offsets = [0, 64], sizes = [8, 32], strides = [1, 1]} : vector<8x128xf32> to vector<8x32xf32>
    %173 = vector.extract_strided_slice %137 {offsets = [0, 64], sizes = [16, 32], strides = [1, 1]} : vector<16x128xf32> to vector<16x32xf32>
    %174 = vector.extract_strided_slice %139 {offsets = [0, 64], sizes = [16, 32], strides = [1, 1]} : vector<16x128xf32> to vector<16x32xf32>
    %cst_73 = arith.constant dense<0.000000e+00> : vector<8x16xf32>
    %175 = tpu.matmul %172, %173, %cst_73 {dimension_numbers = #tpu.dot_dimension_numbers<[1], [1], [0], [0], [0, 0, 1, 0], [], []>} : vector<8x32xf32>, vector<16x32xf32>, vector<8x16xf32> -> vector<8x16xf32>
    %176 = arith.addf %175, %131 : vector<8x16xf32>
    %cst_74 = arith.constant dense<0xFF800000> : vector<8xf32>
    %177 = vector.multi_reduction <maximumf>, %176, %cst_74 [1] : vector<8x16xf32> to vector<8xf32>
    %178 = vector.shape_cast %177 : vector<8xf32> to vector<8x1xf32>
    %179 = vector.broadcast %178 : vector<8x1xf32> to vector<8x16xf32>
    %180 = arith.subf %176, %179 : vector<8x16xf32>
    %181 = math.exp %180 : vector<8x16xf32>
    %cst_75 = arith.constant dense<0.000000e+00> : vector<8xf32>
    %182 = vector.multi_reduction <add>, %181, %cst_75 [1] : vector<8x16xf32> to vector<8xf32>
    %183 = vector.shape_cast %182 : vector<8xf32> to vector<8x1xf32>
    %184 = tpu.reciprocal %183 {approx = true} : vector<8x1xf32> -> vector<8x1xf32>
    %185 = vector.broadcast %184 : vector<8x1xf32> to vector<8x16xf32>
    %186 = arith.mulf %181, %185 : vector<8x16xf32>
    %cst_76 = arith.constant dense<0.000000e+00> : vector<8x32xf32>
    %187 = tpu.matmul %186, %174, %cst_76 {dimension_numbers = #tpu.dot_dimension_numbers<[1], [0], [0], [1], [0, 0, 1, 1], [], []>} : vector<8x16xf32>, vector<16x32xf32>, vector<8x32xf32> -> vector<8x32xf32>
    %188 = vector.extract_strided_slice %135 {offsets = [0, 96], sizes = [8, 32], strides = [1, 1]} : vector<8x128xf32> to vector<8x32xf32>
    %189 = vector.extract_strided_slice %137 {offsets = [0, 96], sizes = [16, 32], strides = [1, 1]} : vector<16x128xf32> to vector<16x32xf32>
    %190 = vector.extract_strided_slice %139 {offsets = [0, 96], sizes = [16, 32], strides = [1, 1]} : vector<16x128xf32> to vector<16x32xf32>
    %cst_77 = arith.constant dense<0.000000e+00> : vector<8x16xf32>
    %191 = tpu.matmul %188, %189, %cst_77 {dimension_numbers = #tpu.dot_dimension_numbers<[1], [1], [0], [0], [0, 0, 1, 0], [], []>} : vector<8x32xf32>, vector<16x32xf32>, vector<8x16xf32> -> vector<8x16xf32>
    %192 = arith.addf %191, %131 : vector<8x16xf32>
    %cst_78 = arith.constant dense<0xFF800000> : vector<8xf32>
    %193 = vector.multi_reduction <maximumf>, %192, %cst_78 [1] : vector<8x16xf32> to vector<8xf32>
    %194 = vector.shape_cast %193 : vector<8xf32> to vector<8x1xf32>
    %195 = vector.broadcast %194 : vector<8x1xf32> to vector<8x16xf32>
    %196 = arith.subf %192, %195 : vector<8x16xf32>
    %197 = math.exp %196 : vector<8x16xf32>
    %cst_79 = arith.constant dense<0.000000e+00> : vector<8xf32>
    %198 = vector.multi_reduction <add>, %197, %cst_79 [1] : vector<8x16xf32> to vector<8xf32>
    %199 = vector.shape_cast %198 : vector<8xf32> to vector<8x1xf32>
    %200 = tpu.reciprocal %199 {approx = true} : vector<8x1xf32> -> vector<8x1xf32>
    %201 = vector.broadcast %200 : vector<8x1xf32> to vector<8x16xf32>
    %202 = arith.mulf %197, %201 : vector<8x16xf32>
    %cst_80 = arith.constant dense<0.000000e+00> : vector<8x32xf32>
    %203 = tpu.matmul %202, %190, %cst_80 {dimension_numbers = #tpu.dot_dimension_numbers<[1], [0], [0], [1], [0, 0, 1, 1], [], []>} : vector<8x16xf32>, vector<16x32xf32>, vector<8x32xf32> -> vector<8x32xf32>
    %204 = tpu.concatenate %155, %171, %187, %203 in 1 : vector<8x32xf32>, vector<8x32xf32>, vector<8x32xf32>, vector<8x32xf32> -> vector<8x128xf32>
    %c0_81 = arith.constant 0 : index
    %c0_82 = arith.constant 0 : index
    %205 = vector.load %arg16[%c0_81, %c0_82] : memref<128x128xf32, #tpu.memory_space<vmem>>, vector<128x128xf32>
    %cst_83 = arith.constant dense<0.000000e+00> : vector<8x128xf32>
    %206 = tpu.matmul %204, %205, %cst_83 {dimension_numbers = #tpu.dot_dimension_numbers<[1], [0], [0], [1], [0, 0, 1, 1], [], []>} : vector<8x128xf32>, vector<128x128xf32>, vector<8x128xf32> -> vector<8x128xf32>
    %207 = arith.addf %105, %206 : vector<8x128xf32>
    %cst_84 = arith.constant dense<0.000000e+00> : vector<8xf32>
    %208 = vector.multi_reduction <add>, %207, %cst_84 [1] : vector<8x128xf32> to vector<8xf32>
    %209 = vector.shape_cast %208 : vector<8xf32> to vector<8x1xf32>
    %cst_85 = arith.constant 1.280000e+02 : f32
    %210 = vector.broadcast %cst_85 : f32 to vector<8x1xf32>
    %211 = arith.divf %209, %210 : vector<8x1xf32>
    %212 = vector.broadcast %211 : vector<8x1xf32> to vector<8x128xf32>
    %213 = arith.subf %207, %212 : vector<8x128xf32>
    %214 = arith.mulf %213, %213 : vector<8x128xf32>
    %cst_86 = arith.constant dense<0.000000e+00> : vector<8xf32>
    %215 = vector.multi_reduction <add>, %214, %cst_86 [1] : vector<8x128xf32> to vector<8xf32>
    %216 = vector.shape_cast %215 : vector<8xf32> to vector<8x1xf32>
    %cst_87 = arith.constant 0.00787401571 : f32
    %217 = vector.broadcast %cst_87 : f32 to vector<8x1xf32>
    %218 = arith.mulf %216, %217 : vector<8x1xf32>
    %219 = math.sqrt %218 : vector<8x1xf32>
    %cst_88 = arith.constant 9.99999997E-7 : f32
    %220 = vector.broadcast %cst_88 : f32 to vector<8x1xf32>
    %221 = arith.addf %219, %220 : vector<8x1xf32>
    %222 = tpu.reciprocal %221 {approx = true} : vector<8x1xf32> -> vector<8x1xf32>
    %c0_89 = arith.constant 0 : index
    %c0_90 = arith.constant 0 : index
    %223 = vector.load %arg17[%c0_89, %c0_90] : memref<1x128xf32, #tpu.memory_space<vmem>>, vector<1x128xf32>
    %224 = vector.broadcast %211 : vector<8x1xf32> to vector<8x128xf32>
    %225 = arith.subf %207, %224 : vector<8x128xf32>
    %226 = vector.broadcast %222 : vector<8x1xf32> to vector<8x128xf32>
    %227 = arith.mulf %225, %226 : vector<8x128xf32>
    %228 = vector.broadcast %223 : vector<1x128xf32> to vector<8x128xf32>
    %229 = arith.mulf %228, %227 : vector<8x128xf32>
    %c0_91 = arith.constant 0 : index
    %c0_92 = arith.constant 0 : index
    %230 = vector.load %arg18[%c0_91, %c0_92] : memref<1x128xf32, #tpu.memory_space<vmem>>, vector<1x128xf32>
    %231 = vector.broadcast %230 : vector<1x128xf32> to vector<8x128xf32>
    %232 = arith.addf %229, %231 : vector<8x128xf32>
    %c0_93 = arith.constant 0 : index
    %c0_94 = arith.constant 0 : index
    %233 = vector.load %arg19[%c0_93, %c0_94] : memref<128x256xf32, #tpu.memory_space<vmem>>, vector<128x256xf32>
    %cst_95 = arith.constant dense<0.000000e+00> : vector<8x256xf32>
    %234 = tpu.matmul %232, %233, %cst_95 {dimension_numbers = #tpu.dot_dimension_numbers<[1], [0], [0], [1], [0, 0, 1, 1], [], []>} : vector<8x128xf32>, vector<128x256xf32>, vector<8x256xf32> -> vector<8x256xf32>
    %c0_96 = arith.constant 0 : index
    %c0_97 = arith.constant 0 : index
    %235 = vector.load %arg20[%c0_96, %c0_97] : memref<1x256xf32, #tpu.memory_space<vmem>>, vector<1x256xf32>
    %236 = vector.broadcast %235 : vector<1x256xf32> to vector<8x256xf32>
    %237 = arith.addf %234, %236 : vector<8x256xf32>
    %cst_98 = arith.constant 0.000000e+00 : f32
    %238 = vector.broadcast %cst_98 : f32 to vector<8x256xf32>
    %239 = arith.maximumf %237, %238 : vector<8x256xf32>
    %c0_99 = arith.constant 0 : index
    %c0_100 = arith.constant 0 : index
    %240 = vector.load %arg21[%c0_99, %c0_100] : memref<256x128xf32, #tpu.memory_space<vmem>>, vector<256x128xf32>
    %cst_101 = arith.constant dense<0.000000e+00> : vector<8x128xf32>
    %241 = tpu.matmul %239, %240, %cst_101 {dimension_numbers = #tpu.dot_dimension_numbers<[1], [0], [0], [1], [0, 0, 1, 1], [], []>} : vector<8x256xf32>, vector<256x128xf32>, vector<8x128xf32> -> vector<8x128xf32>
    %242 = arith.addf %207, %241 : vector<8x128xf32>
    %c0_102 = arith.constant 0 : index
    %c0_103 = arith.constant 0 : index
    %243 = vector.load %arg22[%c0_102, %c0_103] : memref<1x128xf32, #tpu.memory_space<vmem>>, vector<1x128xf32>
    %244 = vector.broadcast %243 : vector<1x128xf32> to vector<8x128xf32>
    %245 = arith.addf %242, %244 : vector<8x128xf32>
    %c0_104 = arith.constant 0 : index
    %c0_105 = arith.constant 0 : index
    %c0_106 = arith.constant 0 : index
    %246 = vector.load %arg23[%c0_104, %c0_105, %c0_106] : memref<1x8x128xf32, #tpu.memory_space<vmem>>, vector<1x8x128xf32>
    %247 = vector.shape_cast %246 : vector<1x8x128xf32> to vector<8x128xf32>
    %248 = vector.shape_cast %245 : vector<8x128xf32> to vector<1x8x128xf32>
    tpu.vector_store %arg23[%c0_104, %c0_105, %c0_106], %248 {strides = array<i32>} : memref<1x8x128xf32, #tpu.memory_space<vmem>>, vector<1x8x128xf32>,
    return
  }
  func.func @transform_0(%arg0: i32) -> (i32, i32, i32) {
    %c0_i32 = arith.constant 0 : i32
    %c0_i32_0 = arith.constant 0 : i32
    %c0_i32_1 = arith.constant 0 : i32
    return %arg0, %c0_i32, %c0_i32_0 : i32, i32, i32
  }
  func.func @transform_1(%arg0: i32) -> (i32, i32, i32) {
    %c0_i32 = arith.constant 0 : i32
    %c0_i32_0 = arith.constant 0 : i32
    %c0_i32_1 = arith.constant 0 : i32
    return %arg0, %c0_i32, %c0_i32_0 : i32, i32, i32
  }
  func.func @transform_2(%arg0: i32) -> (i32, i32) {
    %c0_i32 = arith.constant 0 : i32
    %c0_i32_0 = arith.constant 0 : i32
    %c0_i32_1 = arith.constant 0 : i32
    return %c0_i32, %c0_i32_0 : i32, i32
  }
  func.func @transform_3(%arg0: i32) -> (i32, i32) {
    %c0_i32 = arith.constant 0 : i32
    %c0_i32_0 = arith.constant 0 : i32
    %c0_i32_1 = arith.constant 0 : i32
    return %c0_i32, %c0_i32_0 : i32, i32
  }
  func.func @transform_4(%arg0: i32) -> (i32, i32) {
    %c0_i32 = arith.constant 0 : i32
    %c0_i32_0 = arith.constant 0 : i32
    %c0_i32_1 = arith.constant 0 : i32
    return %c0_i32, %c0_i32_0 : i32, i32
  }
  func.func @transform_5(%arg0: i32) -> (i32, i32) {
    %c0_i32 = arith.constant 0 : i32
    %c0_i32_0 = arith.constant 0 : i32
    %c0_i32_1 = arith.constant 0 : i32
    return %c0_i32, %c0_i32_0 : i32, i32
  }
  func.func @transform_6(%arg0: i32) -> (i32, i32) {
    %c0_i32 = arith.constant 0 : i32
    %c0_i32_0 = arith.constant 0 : i32
    %c0_i32_1 = arith.constant 0 : i32
    return %c0_i32, %c0_i32_0 : i32, i32
  }
  func.func @transform_7(%arg0: i32) -> (i32, i32) {
    %c0_i32 = arith.constant 0 : i32
    %c0_i32_0 = arith.constant 0 : i32
    %c0_i32_1 = arith.constant 0 : i32
    return %c0_i32, %c0_i32_0 : i32, i32
  }
  func.func @transform_8(%arg0: i32) -> (i32, i32) {
    %c0_i32 = arith.constant 0 : i32
    %c0_i32_0 = arith.constant 0 : i32
    %c0_i32_1 = arith.constant 0 : i32
    return %c0_i32, %c0_i32_0 : i32, i32
  }
  func.func @transform_9(%arg0: i32) -> (i32, i32) {
    %c0_i32 = arith.constant 0 : i32
    %c0_i32_0 = arith.constant 0 : i32
    %c0_i32_1 = arith.constant 0 : i32
    return %c0_i32, %c0_i32_0 : i32, i32
  }
  func.func @transform_10(%arg0: i32) -> (i32, i32) {
    %c0_i32 = arith.constant 0 : i32
    %c0_i32_0 = arith.constant 0 : i32
    %c0_i32_1 = arith.constant 0 : i32
    return %c0_i32, %c0_i32_0 : i32, i32
  }
  func.func @transform_11(%arg0: i32) -> (i32, i32) {
    %c0_i32 = arith.constant 0 : i32
    %c0_i32_0 = arith.constant 0 : i32
    %c0_i32_1 = arith.constant 0 : i32
    return %c0_i32, %c0_i32_0 : i32, i32
  }
  func.func @transform_12(%arg0: i32) -> (i32, i32) {
    %c0_i32 = arith.constant 0 : i32
    %c0_i32_0 = arith.constant 0 : i32
    %c0_i32_1 = arith.constant 0 : i32
    return %c0_i32, %c0_i32_0 : i32, i32
  }
  func.func @transform_13(%arg0: i32) -> (i32, i32) {
    %c0_i32 = arith.constant 0 : i32
    %c0_i32_0 = arith.constant 0 : i32
    %c0_i32_1 = arith.constant 0 : i32
    return %c0_i32, %c0_i32_0 : i32, i32
  }
  func.func @transform_14(%arg0: i32) -> (i32, i32) {
    %c0_i32 = arith.constant 0 : i32
    %c0_i32_0 = arith.constant 0 : i32
    %c0_i32_1 = arith.constant 0 : i32
    return %c0_i32, %c0_i32_0 : i32, i32
  }
  func.func @transform_15(%arg0: i32) -> (i32, i32) {
    %c0_i32 = arith.constant 0 : i32
    %c0_i32_0 = arith.constant 0 : i32
    %c0_i32_1 = arith.constant 0 : i32
    return %c0_i32, %c0_i32_0 : i32, i32
  }
  func.func @transform_16(%arg0: i32) -> (i32, i32) {
    %c0_i32 = arith.constant 0 : i32
    %c0_i32_0 = arith.constant 0 : i32
    %c0_i32_1 = arith.constant 0 : i32
    return %c0_i32, %c0_i32_0 : i32, i32
  }
  func.func @transform_17(%arg0: i32) -> (i32, i32) {
    %c0_i32 = arith.constant 0 : i32
    %c0_i32_0 = arith.constant 0 : i32
    %c0_i32_1 = arith.constant 0 : i32
    return %c0_i32, %c0_i32_0 : i32, i32
  }
  func.func @transform_18(%arg0: i32) -> (i32, i32) {
    %c0_i32 = arith.constant 0 : i32
    %c0_i32_0 = arith.constant 0 : i32
    %c0_i32_1 = arith.constant 0 : i32
    return %c0_i32, %c0_i32_0 : i32, i32
  }
  func.func @transform_19(%arg0: i32) -> (i32, i32) {
    %c0_i32 = arith.constant 0 : i32
    %c0_i32_0 = arith.constant 0 : i32
    %c0_i32_1 = arith.constant 0 : i32
    return %c0_i32, %c0_i32_0 : i32, i32
  }
  func.func @transform_20(%arg0: i32) -> (i32, i32) {
    %c0_i32 = arith.constant 0 : i32
    %c0_i32_0 = arith.constant 0 : i32
    %c0_i32_1 = arith.constant 0 : i32
    return %c0_i32, %c0_i32_0 : i32, i32
  }
  func.func @transform_21(%arg0: i32) -> (i32, i32) {
    %c0_i32 = arith.constant 0 : i32
    %c0_i32_0 = arith.constant 0 : i32
    %c0_i32_1 = arith.constant 0 : i32
    return %c0_i32, %c0_i32_0 : i32, i32
  }
  func.func @transform_22(%arg0: i32) -> (i32, i32, i32) {
    %c0_i32 = arith.constant 0 : i32
    %c0_i32_0 = arith.constant 0 : i32
    %c0_i32_1 = arith.constant 0 : i32
    return %arg0, %c0_i32, %c0_i32_0 : i32, i32, i32
  }
}

</mosaic_0001>

<bundles_post_ra>
// kernel: tpu_custom_call.1
= control target key start
LH: loop header
LB: loop body
LE: loop exit
PB: predicated region body
PF: predicated region fallthrough
CT: control target
= control target key end

     0   :  { %s5773_s0 = inlined_call_operand.hbm [shape: f32[2,8,128], index: 0, kind: input, shape index: {}]   ;;  %s5774_s1 = inlined_call_operand.hbm [shape: f32[2,16,128], index: 1, kind: input, shape index: {}]   ;;  %s5775_s2 = inlined_call_operand.hbm [shape: f32[8,8], index: 2, kind: input, shape index: {}]   ;;  %s5776_s3 = inlined_call_operand.hbm [shape: f32[8,16], index: 3, kind: input, shape index: {}]   ;;  %s5777_s4 = inlined_call_operand.vmem [shape: f32[1,128], index: 4, kind: input, shape index: {}]   ;;  %s5778_s5 = inlined_call_operand.vmem [shape: f32[1,128], index: 5, kind: input, shape index: {}]   ;;  %s5779_s6 = inlined_call_operand.hbm [shape: f32[128,128], index: 6, kind: input, shape index: {}]   ;;  %s5780_s7 = inlined_call_operand.hbm [shape: f32[128,128], index: 7, kind: input, shape index: {}]   ;;  %s5781_s8 = inlined_call_operand.hbm [shape: f32[128,128], index: 8, kind: input, shape index: {}]   ;;  %s5782_s9 = inlined_call_operand.hbm [shape: f32[128,128], index: 9, kind: input, shape index: {}]   ;;  %s5783_s10 = inlined_call_operand.vmem [shape: f32[1,128], index: 10, kind: input, shape index: {}]   ;;  %s5784_s11 = inlined_call_operand.vmem [shape: f32[1,128], index: 11, kind: input, shape index: {}]   ;;  %s5785_s12 = inlined_call_operand.hbm [shape: f32[128,128], index: 12, kind: input, shape index: {}]   ;;  %s5786_s13 = inlined_call_operand.hbm [shape: f32[128,128], index: 13, kind: input, shape index: {}]   ;;  %s5787_s14 = inlined_call_operand.hbm [shape: f32[128,128], index: 14, kind: input, shape index: {}]   ;;  %s5788_s15 = inlined_call_operand.hbm [shape: f32[128,128], index: 15, kind: input, shape index: {}]   ;;  %s5789_s16 = inlined_call_operand.vmem [shape: f32[1,128], index: 16, kind: input, shape index: {}]   ;;  %s5790_s17 = inlined_call_operand.vmem [shape: f32[1,128], index: 17, kind: input, shape index: {}]   ;;  %s5791_s18 = inlined_call_operand.hbm [shape: f32[128,256], index: 18, kind: input, shape index: {}]   ;;  %s5792_s19 = inlined_call_operand.vmem [shape: f32[1,256], index: 19, kind: input, shape index: {}]   ;;  %s5793_s20 = inlined_call_operand.hbm [shape: f32[256,128], index: 20, kind: input, shape index: {}]   ;;  %s5794_s21 = inlined_call_operand.vmem [shape: f32[1,128], index: 21, kind: input, shape index: {}]   ;;  %s5795_s22 = inlined_call_operand.hbm [shape: f32[2,8,128], index: 22, kind: output, shape index: {}]  }
   0x1   :  { %5805 = sst [smem:[#allocation36_spill]] %s5773_s0 }
   0x2   :  { %5806 = sst [smem:[#allocation37_spill]] %s5774_s1 }
   0x3   :  { %5807 = sst [smem:[#allocation38_spill]] %s5775_s2 }
   0x4   :  { %5808 = sst [smem:[#allocation39_spill]] %s5776_s3 }
   0x5   :  { %5809 = sst [smem:[#allocation40_spill]] %s5777_s4 }
   0x6   :  { %5810 = sst [smem:[#allocation41_spill]] %s5778_s5 }
   0x7   :  { %5811 = sst [smem:[#allocation42_spill]] %s5779_s6 }
   0x8   :  { %5812 = sst [smem:[#allocation43_spill]] %s5780_s7 }
   0x9   :  { %5813 = sst [smem:[#allocation44_spill]] %s5781_s8 }
   0xa   :  { %5814 = sst [smem:[#allocation45_spill]] %s5782_s9 }
   0xb   :  { %5815 = sst [smem:[#allocation46_spill]] %s5785_s12 }
   0xc   :  { %5816 = sst [smem:[#allocation47_spill]] %s5786_s13 }
   0xd   :  { %5817 = sst [smem:[#allocation48_spill]] %s5787_s14 }
   0xe   :  { %5818 = sst [smem:[#allocation49_spill]] %s5788_s15 }
   0xf   :  { %5819 = sst [smem:[#allocation50_spill]] %s5791_s18 }
  0x10   :  { %5820 = sst [smem:[#allocation51_spill]] %s5792_s19 }
  0x11   :  { %5821 = sst [smem:[#allocation52_spill]] %s5793_s20 }
  0x12   :  { %5822 = sst [smem:[#allocation53_spill]] %s5794_s21 }
  0x13   :  { %5823 = sst [smem:[#allocation54_spill]] %s5795_s22 }
  0x14   :  { %27 = vsyncpa [#allocation3], 0 }
  0x15   :  { %29 = vsyncpa [#allocation3 + $0x1], 0 }
  0x16   :  { %30 = vsyncpa [#allocation6], 0 }
  0x17   :  { %32 = vsyncpa [#allocation6 + $0x1], 0 }
  0x18   :  { %33 = vsyncpa [#allocation9], 0 }
  0x19   :  { %34 = vsyncpa [#allocation12], 0 }
  0x1a   :  { %35 = vsyncpa [#allocation15], 0 }
  0x1b   :  { %36 = vsyncpa [#allocation18], 0 }
  0x1c   :  { %37 = vsyncpa [#allocation21], 0 }
  0x1d   :  { %38 = vsyncpa [#allocation24], 0 }
  0x1e   :  { %39 = vsyncpa [#allocation4], 0 }
  0x1f   :  { %41 = vsyncpa [#allocation4 + $0x1], 0  ;;  %s5036_s3 = smov 0   ;;  %s5038_s28 = smov 0  }
  0x20   :  { %s5040_s29 = smov 0   ;;  %s5042_s30 = smov 0  }
  0x21 LB: > { %s4897_s4 = smov [#allocation7]   ;;  %s5057_s23 = sadd.s32 4294967295, %s4895_s30   ;;  %s4895_s30 = sphi %s5042_s30, %s5877_s30   ;;  %s4891_s29 = sphi %s5040_s29, %s5876_s29   ;;  %s4887_s28 = sphi %s5038_s28, %s5875_s28   ;;  %s4883_s3 = sphi %s5036_s3, %s5874_s3  }
  0x22   : > { %s563_s0 = sshll.u32 %s4897_s4, 4  ;;  %p3542_p0 = scmp.ge.s32.totalorder %s4895_s30, 1  ;;  %s564_s0 = int_to_ptr.vmem [resolvable:$true] %s563_s0 }
  0x23   : > { %p5799_p1 = scmp.eq.s32.totalorder %s5057_s23, 0  ;;  %p550_p2 = scmp.lt.s32.totalorder %s4895_s30, 3 }
  0x24   : > { %s4898_s5 = smov [#allocation8]   ;;  %s4899_s25 = smov [#allocation11]  }
  0x25   : > { %p5062_p3 = pnand %p3542_p0, %p550_p2  ;;  %s574_s24 = sshll.u32 %s4898_s5, 4  ;;  %s575_s24 = int_to_ptr.vmem [resolvable:$true] %s574_s24 }
  0x26   : > { %s603_s26 = sshll.u32 %s4899_s25, 4  ;;  %s4442_s27 = scalar_lea.vmem %s564_s0, 128  ;;  %s5075_s26 = int_to_ptr.vmem [resolvable:$true] %s603_s26 }
  0x27   : > { %s5824_s1 = scalar_select %p5062_p3, 1, 0 }
  0x28   : > { %p4260_p5 = pneg %p5062_p3  ;;  %p4443_p8 = scmp.ne.s32.totalorder %s564_s0, %s4442_s27 }
  0x29   : > { %p4450_p11 = scmp.lt.s32.totalorder %s564_s0, %s564_s0  ;;  %p4451_p12 = scmp.lt.s32.totalorder %s4442_s27, %s4442_s27 }
  0x2a   : > { %p5071_p6 = pnand %p4260_p5, %p5799_p1 }
  0x2b   : > { %p4452_p13 = por %p4451_p12, %p4450_p11 }
  0x2c   : > { %p5079_p7 = pneg %p5071_p6 }
  0x2e   : > { %p4445_p9 = pnand %p4443_p8, %p5079_p7 }
  0x30   : > { %p4446_p10 = pneg %p4445_p9 }
  0x32   : > { %p4453_p0 = pnand %p4452_p13, %p4446_p10 }
  0x34   : > { %4456 = shalt.err (!%p4453_p0)
}
  0x35   : > { %s5827_s25 = sld [smem:[#allocation38_spill]]  ;;  %s4468_s22 = scalar_lea.vmem %s575_s24, 128 }
  0x36   : > { %p4469_p2 = scmp.ne.s32.totalorder %s575_s24, %s4468_s22  ;;  %p4476_p1 = scmp.lt.s32.totalorder %s575_s24, %s575_s24 }
  0x37   : > { %p4477_p8 = scmp.lt.s32.totalorder %s4468_s22, %s4468_s22 }
  0x38   : > { %p4471_p5 = pnand %p4469_p2, %p5079_p7 }
  0x39   : > { %p4478_p9 = por %p4477_p8, %p4476_p1 }
  0x3a   : > { %p4472_p4 = pneg %p4471_p5 }
  0x3b   : > { %4263 = dma.hbm_to_vmem [thread:$0]  (!%p5071_p6), %s5827_s25, 128, %s564_s0, [#allocation6]  }
  0x3c   : > { %p4479_p3 = pnand %p4478_p9, %p4472_p4 }
  0x3e   : > { %4482 = shalt.err (!%p4479_p3)
}
  0x3f   : > { %s5828_s19 = sld [smem:[#allocation39_spill]]  ;;  %s4494_s0 = scalar_lea.vmem %s5075_s26, 2048 }
  0x40   : > { %p4495_p10 = scmp.ne.s32.totalorder %s5075_s26, %s4494_s0  ;;  %p4502_p13 = scmp.lt.s32.totalorder %s5075_s26, %s5075_s26 }
  0x41   : > { %p4503_p1 = scmp.lt.s32.totalorder %s4494_s0, %s4494_s0 }
  0x42   : > { %p4497_p11 = pnand %p4495_p10, %p5079_p7 }
  0x43   : > { %p4504_p4 = por %p4503_p1, %p4502_p13 }
  0x44   : > { %p4498_p12 = pneg %p4497_p11 }
  0x45   : > { %4266 = dma.hbm_to_vmem [thread:$0]  (!%p5071_p6), %s5828_s19, 128, %s575_s24, [#allocation9]  }
  0x46   : > { %p4505_p3 = pnand %p4504_p4, %p4498_p12 }
  0x48   : > { %4508 = shalt.err (!%p4505_p3)
}
  0x49   : > { %s5801_s22 = smov 128   ;;  %s5802_s21 = smov 8  }
  0x4a   : > { %s5829_s7 = sld [smem:[#allocation43_spill]]  ;;  %s4902_s4 = smov [#allocation14]  }
  0x4b   : > { %s629_s5 = sshll.u32 %s4902_s4, 4  ;;  %s4903_s25 = smov [#allocation17]   ;;  %s630_s5 = int_to_ptr.vmem [resolvable:$true] %s629_s5 }
  0x4c   : > { %s661_s27 = sshll.u32 %s4903_s25, 4  ;;  %s4520_s0 = scalar_lea.vmem %s630_s5, 2048  ;;  %s662_s27 = int_to_ptr.vmem [resolvable:$true] %s661_s27 }
  0x4d   : > { %p4521_p0 = scmp.ne.s32.totalorder %s630_s5, %s4520_s0  ;;  %p4528_p8 = scmp.lt.s32.totalorder %s630_s5, %s630_s5 }
  0x4e   : > { %p4529_p9 = scmp.lt.s32.totalorder %s4520_s0, %s4520_s0 }
  0x4f   : > { %p4523_p2 = pnand %p4521_p0, %p5079_p7 }
  0x50   : > { %4272 = dma.hbm_to_vmem [thread:$0]  (!%p5071_p6), %s5829_s7, 2048, %s5075_s26, [#allocation12], %s5801_s22, %s5801_s22, %s5802_s21  }
  0x51   : > { %p4524_p5 = pneg %p4523_p2  ;;  %p4530_p10 = por %p4529_p9, %p4528_p8 }
  0x53   : > { %p4531_p11 = pnand %p4530_p10, %p4524_p5 }
  0x55   : > { %4534 = shalt.err (!%p4531_p11)
}
  0x56   : > { %s5830_s9 = sld [smem:[#allocation45_spill]]  ;;  %s4546_s24 = scalar_lea.vmem %s662_s27, 2048 }
  0x57   : > { %p4547_p12 = scmp.ne.s32.totalorder %s662_s27, %s4546_s24  ;;  %p4554_p4 = scmp.lt.s32.totalorder %s662_s27, %s662_s27 }
  0x58   : > { %p4555_p3 = scmp.lt.s32.totalorder %s4546_s24, %s4546_s24 }
  0x59   : > { %p4549_p13 = pnand %p4547_p12, %p5079_p7 }
  0x5a   : > { %p4556_p0 = por %p4555_p3, %p4554_p4 }
  0x5b   : > { %p4550_p1 = pneg %p4549_p13 }
  0x5c   : > { %4278 = dma.hbm_to_vmem [thread:$0]  (!%p5071_p6), %s5830_s9, 2048, %s630_s5, [#allocation15], %s5801_s22, %s5801_s22, %s5802_s21  }
  0x5d   : > { %p4557_p2 = pnand %p4556_p0, %p4550_p1 }
  0x5f   : > { %4560 = shalt.err (!%p4557_p2)
}
  0x60   : > { %s5831_s13 = sld [smem:[#allocation47_spill]]  ;;  %s4904_s5 = smov [#allocation20]  }
  0x61   : > { %s687_s0 = sshll.u32 %s4904_s5, 4  ;;  %s4905_s26 = smov [#allocation10]   ;;  %s688_s0 = int_to_ptr.vmem [resolvable:$true] %s687_s0 }
  0x62   : > { %s590_s19 = sshll.u32 %s4905_s26, 4  ;;  %s4572_s7 = scalar_lea.vmem %s688_s0, 2048  ;;  %s591_s19 = int_to_ptr.vmem [resolvable:$true] %s590_s19 }
  0x63   : > { %p4573_p5 = scmp.ne.s32.totalorder %s688_s0, %s4572_s7  ;;  %p4580_p10 = scmp.lt.s32.totalorder %s688_s0, %s688_s0 }
  0x64   : > { %p4581_p11 = scmp.lt.s32.totalorder %s4572_s7, %s4572_s7 }
  0x65   : > { %p4575_p8 = pnand %p4573_p5, %p5079_p7 }
  0x66   : > { %4284 = dma.hbm_to_vmem [thread:$0]  (!%p5071_p6), %s5831_s13, 2048, %s662_s27, [#allocation18], %s5801_s22, %s5801_s22, %s5802_s21  }
  0x67   : > { %p4576_p9 = pneg %p4575_p8  ;;  %p4582_p12 = por %p4581_p11, %p4580_p10 }
  0x69   : > { %p4583_p13 = pnand %p4582_p12, %p4576_p9 }
  0x6b   : > { %4586 = shalt.err (!%p4583_p13)
}
  0x6c   : > { %s5832_s15 = sld [smem:[#allocation49_spill]]  ;;  %s4598_s4 = scalar_lea.vmem %s591_s19, 2048 }
  0x6d   : > { %p4599_p1 = scmp.ne.s32.totalorder %s591_s19, %s4598_s4  ;;  %p4606_p0 = scmp.lt.s32.totalorder %s591_s19, %s591_s19 }
  0x6e   : > { %p4607_p2 = scmp.lt.s32.totalorder %s4598_s4, %s4598_s4 }
  0x6f   : > { %p4601_p4 = pnand %p4599_p1, %p5079_p7 }
  0x70   : > { %p4608_p5 = por %p4607_p2, %p4606_p0 }
  0x71   : > { %p4602_p3 = pneg %p4601_p4 }
  0x72   : > { %4290 = dma.hbm_to_vmem [thread:$0]  (!%p5071_p6), %s5832_s15, 2048, %s688_s0, [#allocation21], %s5801_s22, %s5801_s22, %s5802_s21  }
  0x73   : > { %p4609_p8 = pnand %p4608_p5, %p4602_p3 }
  0x75   : > { %4612 = shalt.err (!%p4609_p8)
}
  0x76   : > { %s5833_s5 = sld [smem:[#allocation42_spill]]  ;;  %s4906_s0 = smov [#allocation13]  }
  0x77   : > { %s616_s26 = sshll.u32 %s4906_s0, 4  ;;  %s4907_s27 = smov [#allocation16]   ;;  %s617_s26 = int_to_ptr.vmem [resolvable:$true] %s616_s26 }
  0x78   : > { %s648_s24 = sshll.u32 %s4907_s27, 4  ;;  %s4624_s9 = scalar_lea.vmem %s617_s26, 2048  ;;  %s649_s24 = int_to_ptr.vmem [resolvable:$true] %s648_s24 }
  0x79   : > { %p4625_p9 = scmp.ne.s32.totalorder %s617_s26, %s4624_s9  ;;  %p4632_p12 = scmp.lt.s32.totalorder %s617_s26, %s617_s26 }
  0x7a   : > { %p4633_p13 = scmp.lt.s32.totalorder %s4624_s9, %s4624_s9 }
  0x7b   : > { %p4627_p10 = pnand %p4625_p9, %p5079_p7 }
  0x7c   : > { %4269 = dma.hbm_to_vmem [thread:$0]  (!%p5071_p6), %s5833_s5, 2048, %s591_s19, [#allocation9], %s5801_s22, %s5801_s22, %s5802_s21  }
  0x7d   : > { %p4628_p11 = pneg %p4627_p10  ;;  %p4634_p1 = por %p4633_p13, %p4632_p12 }
  0x7f   : > { %p4635_p4 = pnand %p4634_p1, %p4628_p11 }
  0x81   : > { %4638 = shalt.err (!%p4635_p4)
}
  0x82   : > { %s5834_s8 = sld [smem:[#allocation44_spill]]  ;;  %s4650_s7 = scalar_lea.vmem %s649_s24, 2048 }
  0x83   : > { %p4651_p3 = scmp.ne.s32.totalorder %s649_s24, %s4650_s7  ;;  %p4658_p5 = scmp.lt.s32.totalorder %s649_s24, %s649_s24 }
  0x84   : > { %p4659_p8 = scmp.lt.s32.totalorder %s4650_s7, %s4650_s7 }
  0x85   : > { %p4653_p0 = pnand %p4651_p3, %p5079_p7 }
  0x86   : > { %p4660_p9 = por %p4659_p8, %p4658_p5 }
  0x87   : > { %p4654_p2 = pneg %p4653_p0 }
  0x88   : > { %4275 = dma.hbm_to_vmem [thread:$0]  (!%p5071_p6), %s5834_s8, 2048, %s617_s26, [#allocation12], %s5801_s22, %s5801_s22, %s5802_s21  }
  0x89   : > { %p4661_p10 = pnand %p4660_p9, %p4654_p2 }
  0x8b   : > { %4664 = shalt.err (!%p4661_p10)
}
  0x8c   : > { %s5835_s12 = sld [smem:[#allocation46_spill]]  ;;  %s4908_s5 = smov [#allocation19]  }
  0x8d   : > { %s674_s0 = sshll.u32 %s4908_s5, 4  ;;  %s4909_s26 = smov [#allocation22]   ;;  %s675_s0 = int_to_ptr.vmem [resolvable:$true] %s674_s0 }
  0x8e   : > { %s706_s27 = sshll.u32 %s4909_s26, 4  ;;  %s4676_s19 = scalar_lea.vmem %s675_s0, 2048  ;;  %s707_s27 = int_to_ptr.vmem [resolvable:$true] %s706_s27 }
  0x8f   : > { %p4677_p11 = scmp.ne.s32.totalorder %s675_s0, %s4676_s19  ;;  %p4684_p1 = scmp.lt.s32.totalorder %s675_s0, %s675_s0 }
  0x90   : > { %p4685_p4 = scmp.lt.s32.totalorder %s4676_s19, %s4676_s19 }
  0x91   : > { %p4679_p12 = pnand %p4677_p11, %p5079_p7 }
  0x92   : > { %4281 = dma.hbm_to_vmem [thread:$0]  (!%p5071_p6), %s5835_s12, 2048, %s649_s24, [#allocation15], %s5801_s22, %s5801_s22, %s5802_s21  }
  0x93   : > { %p4680_p13 = pneg %p4679_p12  ;;  %p4686_p3 = por %p4685_p4, %p4684_p1 }
  0x95   : > { %p4687_p0 = pnand %p4686_p3, %p4680_p13 }
  0x97   : > { %4690 = shalt.err (!%p4687_p0)
}
  0x98   : > { %s5836_s14 = sld [smem:[#allocation48_spill]]  ;;  %s4702_s7 = scalar_lea.vmem %s707_s27, 4096 }
  0x99   : > { %p4703_p2 = scmp.ne.s32.totalorder %s707_s27, %s4702_s7  ;;  %p4710_p9 = scmp.lt.s32.totalorder %s707_s27, %s707_s27 }
  0x9a   : > { %p4711_p10 = scmp.lt.s32.totalorder %s4702_s7, %s4702_s7 }
  0x9b   : > { %p4705_p5 = pnand %p4703_p2, %p5079_p7 }
  0x9c   : > { %p4712_p11 = por %p4711_p10, %p4710_p9 }
  0x9d   : > { %p4706_p8 = pneg %p4705_p5 }
  0x9e   : > { %4287 = dma.hbm_to_vmem [thread:$0]  (!%p5071_p6), %s5836_s14, 2048, %s675_s0, [#allocation18], %s5801_s22, %s5801_s22, %s5802_s21  }
  0x9f   : > { %p4713_p12 = pnand %p4712_p11, %p4706_p8 }
  0xa1   : > { %4716 = shalt.err (!%p4713_p12)
}
  0xa2   : > { %s4910_s9 = smov 256   ;;  %s4911_s25 = smov 16  }
  0xa3   : > { %s5837_s18 = sld [smem:[#allocation50_spill]]  ;;  %s4912_s0 = smov [#allocation23]  }
  0xa4   : > { %s722_s19 = sshll.u32 %s4912_s0, 4  ;;  %s723_s19 = int_to_ptr.vmem [resolvable:$true] %s722_s19 }
  0xa5   : > { %s4728_s24 = scalar_lea.vmem %s723_s19, 4096  ;;  %p4736_p3 = scmp.lt.s32.totalorder %s723_s19, %s723_s19 }
  0xa6   : > { %p4729_p13 = scmp.ne.s32.totalorder %s723_s19, %s4728_s24  ;;  %p4737_p0 = scmp.lt.s32.totalorder %s4728_s24, %s4728_s24 }
  0xa8   : > { %p4731_p1 = pnand %p4729_p13, %p5079_p7  ;;  %p4738_p2 = por %p4737_p0, %p4736_p3 }
  0xa9   : > { %4293 = dma.hbm_to_vmem [thread:$0]  (!%p5071_p6), %s5837_s18, 4096, %s707_s27, [#allocation21], %s4910_s9, %s4910_s9, %s4911_s25  }
  0xaa   : > { %p4732_p4 = pneg %p4731_p1 }
  0xac   : > { %p4739_p5 = pnand %p4738_p2, %p4732_p4 }
  0xae   : > { %4742 = shalt.err (!%p4739_p5)
}
  0xaf   : > { %s5838_s20 = sld [smem:[#allocation52_spill]]  ;;  %s3541_s6 = sadd.s32 4294967294, %s4895_s30  }
  0xb0   : > { %s5201_s2 = sadd.s32 1, %s4895_s30   ;;  %s54_s9 = sadd.s32 1, %s4891_s29 }
  0xb1   : > { %s51_s7 = ssub.s32 %s4895_s30, %s5201_s2  ;;  %p61_p8 = scmp.ne.s32.totalorder %s4891_s29, %s4887_s28 }
  0xb2   : > { %p52_p7 = scmp.eq.s32.totalorder %s51_s7, 0  ;;  %p62_p9 = scmp.eq.s32.totalorder %s4895_s30, 0 }
  0xb3   : > { %p67_p10 = scmp.ne.s32.totalorder %s4887_s28, %s4883_s3  ;;  %p5840_p12 = scmp.eq.s32.totalorder %s5057_s23, 0 }
  0xb4   : > { %s5212_s25 = scalar_select %p52_p7, %s4891_s29, %s54_s9  }
  0xb5   : > { %4296 = dma.hbm_to_vmem [thread:$0]  (!%p5071_p6), %s5838_s20, 4096, %s723_s19, [#allocation24], %s5801_s22, %s5801_s22, %s5802_s21  }
  0xb6   : > { %p5214_p11 = por %p62_p9, %p61_p8  ;;  %p5220_p6 = por %p5840_p12, %p67_p10 }
  0xb7   : > { %p537_p13 = scmp.eq.s32.totalorder %s5057_s23, 1  ;;  %p543_p1 = scmp.eq.s32.totalorder %s3541_s6, 1 }
  0xb8   : > { %p4320_p4 = scmp.lt.s32.totalorder %s4895_s30, 2  ;;  %s5227_s0 = sand.u32 1, %s4891_s29  }
  0xb9   : > { %p5229_p3 = por %p537_p13, %p61_p8  ;;  %p5233_p0 = por %p543_p1, %p67_p10 }
  0xba   : > { %s3556_s4 = sshll.u32 %s5227_s0, 3  ;;  %s3557_s27 = sshll.u32 %s4895_s30, 7 }
  0xbb   : > { %s5842_s19 = scalar_select %p5229_p3, 1, 0 }
  0xbc   : > { %s5843_s24 = scalar_select %p5233_p0, 1, 0 }
  0xbd   : > { %s5844_s22 = sld [smem:[#allocation36_spill]]  ;;  %s743_s21 = scalar_lea.vmem [#allocation2], %s3556_s4 }
  0xbe   : > { %s750_s8 = sshll.u32 %s743_s21, 4  ;;  %p5248_p2 = pnand %p4320_p4, %p5214_p11  ;;  %s5244_s8 = int_to_ptr.vmem [resolvable:$true] %s750_s8 }
  0xbf   : > { %s740_s15 = scalar_lea.sflag [#allocation3], %s5227_s0 }
  0xc0   : > { %p4745_p7 = pneg %p5248_p2 }
  0xc3   : > { %s5242_s6 = scalar_lea.hbm %s5844_s22, %s3557_s27  ;;  %s4748_s5 = scalar_lea.hbm %s5844_s22, 256 }
  0xc4   : > { %s4743_s7 = scalar_lea.hbm %s5242_s6, 128  ;;  %p4749_p10 = scmp.lt.s32.totalorder %s5242_s6, %s5844_s22 }
  0xc5   : > { %p4744_p5 = scmp.ne.s32.totalorder %s5242_s6, %s4743_s7  ;;  %p4750_p11 = scmp.lt.s32.totalorder %s4748_s5, %s4743_s7 }
  0xc7   : > { %p4746_p8 = pnand %p4745_p7, %p4744_p5  ;;  %p4751_p12 = por %p4750_p11, %p4749_p10 }
  0xc9   : > { %p4747_p9 = pneg %p4746_p8 }
  0xcb   : > { %p4752_p13 = pnand %p4751_p12, %p4747_p9 }
  0xcd   : > { %4755 = shalt.err (!%p4752_p13)
}
  0xce   : > { %s4756_s14 = scalar_lea.vmem %s5244_s8, 128  ;;  %s4913_s21 = smov [#allocation2]  }
  0xcf   : > { %p4757_p1 = scmp.ne.s32.totalorder %s5244_s8, %s4756_s14  ;;  %s4761_s4 = sshll.u32 %s4913_s21, 4  ;;  %s4762_s4 = int_to_ptr.vmem [resolvable:$false] %s4761_s4 }
  0xd0   : > { %s4763_s13 = scalar_lea.vmem %s4762_s4, 256  ;;  %p4764_p8 = scmp.lt.s32.totalorder %s5244_s8, %s4762_s4 }
  0xd1   : > { %p4759_p4 = pnand %p4757_p1, %p4745_p7  ;;  %p4765_p0 = scmp.lt.s32.totalorder %s4763_s13, %s4756_s14 }
  0xd3   : > { %p4760_p5 = pneg %p4759_p4  ;;  %p4766_p3 = por %p4765_p0, %p4764_p8 }
  0xd5   : > { %p4767_p10 = pnand %p4766_p3, %p4760_p5 }
  0xd7   : > { %4770 = shalt.err (!%p4767_p10)
}
  0xd8   : > { %4300 = dma.hbm_to_vmem [thread:$0]  (!%p5248_p2), %s5242_s6, 128, %s5244_s8, %s740_s15  }
  0xd9   : > { %s5846_s7 = sshll.u32 %s5227_s0, 4  ;;  %s3616_s9 = sshll.u32 %s4895_s30, 8 }
  0xda   : > { %s761_s5 = scalar_lea.vmem [#allocation5], %s5846_s7  ;;  %s5847_s14 = sld [smem:[#allocation37_spill]] }
  0xdb   : > { %s768_s27 = sshll.u32 %s761_s5, 4  ;;  %s5848_s18 = sand.u32 1, %s4895_s30   ;;  %s5281_s27 = int_to_ptr.vmem [resolvable:$true] %s768_s27 }
  0xdc   : > { %s758_s20 = scalar_lea.sflag [#allocation6], %s5848_s18 }
  0xe0   : > { %s5287_s4 = scalar_lea.hbm %s5847_s14, %s3616_s9  ;;  %s4776_s0 = scalar_lea.hbm %s5847_s14, 512 }
  0xe1   : > { %s4771_s22 = scalar_lea.hbm %s5287_s4, 256  ;;  %p4777_p11 = scmp.lt.s32.totalorder %s5287_s4, %s5847_s14 }
  0xe2   : > { %p4772_p3 = scmp.ne.s32.totalorder %s5287_s4, %s4771_s22  ;;  %p4778_p12 = scmp.lt.s32.totalorder %s4776_s0, %s4771_s22 }
  0xe4   : > { %p4774_p0 = pnand %p4772_p3, %p4745_p7  ;;  %p4779_p13 = por %p4778_p12, %p4777_p11 }
  0xe6   : > { %p4775_p9 = pneg %p4774_p0 }
  0xe8   : > { %p4780_p1 = pnand %p4779_p13, %p4775_p9 }
  0xea   : > { %4783 = shalt.err (!%p4780_p1)
}
  0xeb   : > { %s4784_s18 = scalar_lea.vmem %s5281_s27, 256  ;;  %s4914_s5 = smov [#allocation5]  }
  0xec   : > { %p4785_p4 = scmp.ne.s32.totalorder %s5281_s27, %s4784_s18  ;;  %s4789_s9 = sshll.u32 %s4914_s5, 4  ;;  %s4790_s9 = int_to_ptr.vmem [resolvable:$false] %s4789_s9 }
  0xed   : > { %s4791_s21 = scalar_lea.vmem %s4790_s9, 512  ;;  %p4792_p10 = scmp.lt.s32.totalorder %s5281_s27, %s4790_s9 }
  0xee   : > { %p4787_p5 = pnand %p4785_p4, %p4745_p7  ;;  %p4793_p3 = scmp.lt.s32.totalorder %s4791_s21, %s4784_s18 }
  0xf0   : > { %p4788_p8 = pneg %p4787_p5  ;;  %p4794_p0 = por %p4793_p3, %p4792_p10 }
  0xf2   : > { %p4795_p11 = pnand %p4794_p0, %p4788_p8 }
  0xf4   : > { %4798 = shalt.err (!%p4795_p11)
}
  0xf5   : > { %s5849_s22 = smov 8   ;;  %s5850_s13 = smov 128  }
  0xf6   : > { %4303 = dma.hbm_to_vmem [thread:$0]  (!%p5248_p2), %s5287_s4, 256, %s5281_s27, %s758_s20, %s5850_s13, %s5850_s13, %s5849_s22  }
  0xf7   : > { %p5851_p7 = scmp.ne.s32.totalorder %s5824_s1, 0 }
  0xf8   : > { %s5319_s8 = sand.u32 (!%p5851_p7), 1, %s4887_s28  }
  0xf9   : > { %780 = sbr.rel (%p5851_p7) target bundleno = 6651 (0x19fb), region = 108  ;;  %s3562_s15 = sshll.u32 (!%p5851_p7), %s5319_s8, 3 }
  0xfa   : > { %s783_s0 = scalar_lea.sflag (!%p5851_p7), [#allocation3], %s5319_s8  ;;  %s786_s12 = scalar_lea.vmem (!%p5851_p7), [#allocation2], %s3562_s15 }
  0xfe   : > { %4842 = dma.done.wait (%p5220_p6), %s783_s0, 128  }
  0xff   : > { %4844 = vsyncadd (%p5220_p6), %s783_s0, 4294967168  ;;  %s791_s20 = sand.u32 1, %s5057_s23   ;;  %s3563_s1 = sshll.u32 %s5319_s8, 4 }
 0x100   : > { %s792_s27 = scalar_lea.sflag [#allocation6], %s791_s20  ;;  %s5331_s4 = scalar_lea.vmem [#allocation5], %s3563_s1 }
 0x101   : > { %4846 = dma.done.wait (%p5220_p6), %s792_s27, 256  }
 0x102   : > { %4848 = vsyncadd (%p5220_p6), %s792_s27, 4294967040  ;;  %p5852_p2 = scmp.eq.s32.totalorder %s5057_s23, 0 }
 0x104   : > { %4850 = dma.done.wait (%p5852_p2), [#allocation6], 128   ;;  %p5853_p9 = pmov %p5852_p2 }
 0x105   : > { %p5854_p12 = pmov %p5852_p2 }
 0x106   : > { %4852 = vsyncadd (%p5853_p9), [#allocation6], 4294967168 }
 0x107   : > { %4854 = dma.done.wait (%p5854_p12), [#allocation9], 2176   ;;  %p5855_p13 = pmov %p5852_p2 }
 0x108   : > { %p5856_p1 = pmov %p5852_p2 }
 0x109   : > { %4856 = vsyncadd (%p5855_p13), [#allocation9], 4294965120 }
 0x10a   : > { %4858 = dma.done.wait (%p5856_p1), [#allocation12], 4096   ;;  %p5857_p4 = pmov %p5856_p1 }
 0x10b   : > { %p5858_p6 = pmov %p5856_p1 }
 0x10c   : > { %4860 = vsyncadd (%p5857_p4), [#allocation12], 4294963200 }
 0x10d   : > { %4862 = dma.done.wait (%p5858_p6), [#allocation15], 4096   ;;  %p5859_p5 = pmov %p5856_p1 }
 0x10e   : > { %p5860_p8 = pmov %p5856_p1 }
 0x10f   : > { %4864 = vsyncadd (%p5859_p5), [#allocation15], 4294963200 }
 0x110   : > { %4866 = dma.done.wait (%p5860_p8), [#allocation18], 4096   ;;  %p5861_p10 = pmov %p5856_p1 }
 0x111   : > { %p5862_p3 = pmov %p5856_p1 }
 0x112   : > { %4868 = vsyncadd (%p5861_p10), [#allocation18], 4294963200 }
 0x113   : > { %4870 = dma.done.wait (%p5862_p3), [#allocation21], 6144   ;;  %p5863_p0 = pmov %p5856_p1 }
 0x115   : > { %4872 = vsyncadd (%p5863_p0), [#allocation21], 4294961152  ;;  %p5864_p11 = pmov %p5863_p0 }
 0x116   : > { %p5865_p7 = pmov %p5863_p0 }
 0x117   : > { %4874 = dma.done.wait (%p5864_p11), [#allocation24], 4096  }
 0x118   : > { %4876 = vsyncadd (%p5865_p7), [#allocation24], 4294963200  ;;  %v5365_v0 = vld [vmem:[%s786_s12] sm:$0xff]  ;;  %v4915_v5 = vmov 0.0   ;;  %v963_v6 = vld [vmem:[#allocation10 + $0x78] sm:$0xff]  ;;  %vm4916_vm0 = vmmov 0  }
 0x119   : > { %912 = vadd.xlane.f32.xlu0 %v5365_v0  ;;  %3830 = vmatprep.subr.mxu0 %v4915_v5  ;;  %v1050_v7 = vld [vmem:[#allocation11 + $0x78] sm:$0xff]  ;;  %v962_v8 = vld [vmem:[#allocation10 + $0x70] sm:$0xff]  ;;  %v961_v10 = vld [vmem:[#allocation10 + $0x68] sm:$0xff]  ;;  %s5866_s7 = sld [smem:[#allocation40_spill]]  ;;  %vm1207_vm3 = vcmask 261120   ;;  %s4917_s21 = smov 96  }
 0x11a   : > { %3865 = vmatprep.subr.mxu1 %v4915_v5  ;;  %3831 = vmatpush3.msra.mxu0 %v963_v6  ;;  %v1049_v9 = vld [vmem:[#allocation11 + $0x70] sm:$0xff]  ;;  %v1048_v11 = vld [vmem:[#allocation11 + $0x68] sm:$0xff]  ;;  %v960_v12 = vld [vmem:[#allocation10 + $0x60] sm:$0xff]  ;;  %s5867_s9 = sld [smem:[#allocation41_spill]]  ;;  %vm1284_vm4 = vcmask 64512   ;;  %s4918_s22 = smov 64  }
 0x11b   : > { %3832 = vmatprep.subr.mxu0 %v4915_v5  ;;  %3866 = vmatpush3.msra.mxu1 %v1050_v7  ;;  %v1047_v13 = vld [vmem:[#allocation11 + $0x60] sm:$0xff]  ;;  %v959_v14 = vld [vmem:[#allocation10 + $0x58] sm:$0xff]  ;;  %v958_v16 = vld [vmem:[#allocation10 + $0x50] sm:$0xff]  ;;  %s4919_s13 = smov 32   ;;  %vm1878_vm5 = vcmask 523264   ;;  %vm1880_vm6 = vcmask 785408  }
 0x11c   : > { %3833 = vmatpush3.msra.mxu0 %v962_v8  ;;  %3867 = vmatprep.subr.mxu1 %v4915_v5  ;;  %v1046_v15 = vld [vmem:[#allocation11 + $0x58] sm:$0xff]  ;;  %v1045_v17 = vld [vmem:[#allocation11 + $0x50] sm:$0xff]  ;;  %v957_v18 = vld [vmem:[#allocation10 + $0x48] sm:$0xff]  ;;  %vm2352_vm9 = vcmask 130048   ;;  %s5868_s5 = sld [smem:[#allocation51_spill]]  ;;  %s908_s0 = scalar_lea.vmem [#allocation25], %s3562_s15 }
 0x11d   : > { %3834 = vmatprep.subr.mxu0 %v4915_v5  ;;  %3868 = vmatpush3.msra.mxu1 %v1049_v9  ;;  %v1044_v19 = vld [vmem:[#allocation11 + $0x48] sm:$0xff]  ;;  %v956_v20 = vld [vmem:[#allocation10 + $0x40] sm:$0xff]  ;;  %v955_v22 = vld [vmem:[#allocation10 + $0x38] sm:$0xff]  ;;  %s3334_s12 = sshll.u32 %s908_s0, 4  ;;  %s5870_s27 = sld [smem:[#allocation54_spill]]  ;;  %s3335_s12 = int_to_ptr.vmem [resolvable:$true] %s3334_s12 }
 0x11e   : > { %3835 = vmatpush3.msra.mxu0 %v961_v10  ;;  %3869 = vmatprep.subr.mxu1 %v4915_v5  ;;  %v1043_v21 = vld [vmem:[#allocation11 + $0x40] sm:$0xff]  ;;  %v1042_v23 = vld [vmem:[#allocation11 + $0x38] sm:$0xff]  ;;  %v954_v24 = vld [vmem:[#allocation10 + $0x30] sm:$0xff]  ;;  %s3321_s26 = scalar_lea.sflag [#allocation4], %s5319_s8  ;;  %s4799_s6 = scalar_lea.vmem %s3335_s12, 128 }
 0x11f   : > { %3836 = vmatprep.subr.mxu0 %v4915_v5  ;;  %3870 = vmatpush3.msra.mxu1 %v1048_v11  ;;  %v1041_v25 = vld [vmem:[#allocation11 + $0x30] sm:$0xff]  ;;  %v953_v26 = vld [vmem:[#allocation10 + $0x28] sm:$0xff]  ;;  %v952_v28 = vld [vmem:[#allocation10 + $0x20] sm:$0xff]  ;;  %p4800_p2 = scmp.ne.s32.totalorder %s3335_s12, %s4799_s6  ;;  %p5871_p9 = scmp.ne.s32.totalorder %s5842_s19, 0 }
 0x120   : > { %3837 = vmatpush3.msra.mxu0 %v960_v12  ;;  %3871 = vmatprep.subr.mxu1 %v4915_v5  ;;  %v1040_v27 = vld [vmem:[#allocation11 + $0x28] sm:$0xff]  ;;  %v1039_v29 = vld [vmem:[#allocation11 + $0x20] sm:$0xff]  ;;  %v951_v30 = vld [vmem:[#allocation10 + $0x18] sm:$0xff] }
 0x121   : > { %3838 = vmatprep.subr.mxu0 %v4915_v5  ;;  %3872 = vmatpush3.msra.mxu1 %v1047_v13  ;;  %v1038_v31 = vld [vmem:[#allocation11 + $0x18] sm:$0xff]  ;;  %v950_v32 = vld [vmem:[#allocation10 + $0x10] sm:$0xff]  ;;  %v949_v34 = vld [vmem:[#allocation10 + $0x8] sm:$0xff]  ;;  %p4801_p12 = pnand %p4800_p2, %p5871_p9 }
 0x122   : > { %3839 = vmatpush3.msra.mxu0 %v959_v14  ;;  %3873 = vmatprep.subr.mxu1 %v4915_v5  ;;  %v1037_v33 = vld [vmem:[#allocation11 + $0x10] sm:$0xff]  ;;  %v1036_v35 = vld [vmem:[#allocation11 + $0x8] sm:$0xff]  ;;  %v948_v36 = vld [vmem:[#allocation10] sm:$0xff] }
 0x123   : > { %3840 = vmatprep.subr.mxu0 %v4915_v5  ;;  %3874 = vmatpush3.msra.mxu1 %v1046_v15  ;;  %v1035_v37 = vld [vmem:[#allocation11] sm:$0xff]  ;;  %v1136_v52 = vld [vmem:[#allocation13 + $0x78] sm:$0xff]  ;;  %v1135_v53 = vld [vmem:[#allocation13 + $0x70] sm:$0xff]  ;;  %p4802_p13 = pneg %p4801_p12 }
 0x124   : > { %3841 = vmatpush3.msra.mxu0 %v958_v16  ;;  %3875 = vmatprep.subr.mxu1 %v4915_v5  ;;  %v3577_v47 = vld [vmem:[%s5866_s7] ss:$0 sm:$0xff]  ;;  %v1134_v54 = vld [vmem:[#allocation13 + $0x68] sm:$0xff]  ;;  %v1132_v56 = vld [vmem:[#allocation13 + $0x58] sm:$0xff]  ;;  %s4920_s7 = smov [#allocation25]  }
 0x125   : > { %3842 = vmatprep.subr.mxu0 %v4915_v5  ;;  %3876 = vmatpush3.msra.mxu1 %v1045_v17  ;;  %v3578_v49 = vld [vmem:[%s5867_s9] ss:$0 sm:$0xff]  ;;  %v1131_v57 = vld [vmem:[#allocation13 + $0x50] sm:$0xff]  ;;  %v1130_v58 = vld [vmem:[#allocation13 + $0x48] sm:$0xff] }
 0x126   : > { %3843 = vmatpush3.msra.mxu0 %v957_v18  ;;  %3877 = vmatprep.subr.mxu1 %v4915_v5  ;;  %v1133_v55 = vld [vmem:[#allocation13 + $0x60] sm:$0xff]  ;;  %v1128_v60 = vld [vmem:[#allocation13 + $0x38] sm:$0xff]  ;;  %v1127_v61 = vld [vmem:[#allocation13 + $0x30] sm:$0xff] }
 0x127   : > { %3844 = vmatprep.subr.mxu0 %v4915_v5  ;;  %3878 = vmatpush3.msra.mxu1 %v1044_v19  ;;  %v1129_v59 = vld [vmem:[#allocation13 + $0x40] sm:$0xff]  ;;  %v1126_v62 = vld [vmem:[#allocation13 + $0x28] sm:$0xff]  ;;  %v5457_v13 = vld [vmem:[#allocation7] sm:$0xff] }
 0x128   : > { %3845 = vmatpush3.msra.mxu0 %v956_v20  ;;  %3879 = vmatprep.subr.mxu1 %v4915_v5  ;;  %v1125_v63 = vld [vmem:[#allocation13 + $0x20] sm:$0xff] }
 0x129   : > { %3846 = vmatprep.subr.mxu0 %v4915_v5  ;;  %3880 = vmatpush3.msra.mxu1 %v1043_v21 }
 0x12a   : > { %3847 = vmatpush3.msra.mxu0 %v955_v22  ;;  %3881 = vmatprep.subr.mxu1 %v4915_v5 }
 0x12b   : > { %3848 = vmatprep.subr.mxu0 %v4915_v5  ;;  %3882 = vmatpush3.msra.mxu1 %v1042_v23 }
 0x12c   : > { %3849 = vmatpush3.msra.mxu0 %v954_v24  ;;  %3883 = vmatprep.subr.mxu1 %v4915_v5 }
 0x12d   : > { %3850 = vmatprep.subr.mxu0 %v4915_v5  ;;  %3884 = vmatpush3.msra.mxu1 %v1041_v25 }
 0x12e   : > { %3851 = vmatpush3.msra.mxu0 %v953_v26  ;;  %3885 = vmatprep.subr.mxu1 %v4915_v5 }
 0x12f   : > { %3852 = vmatprep.subr.mxu0 %v4915_v5  ;;  %3886 = vmatpush3.msra.mxu1 %v1040_v27 }
 0x130   : > { %3853 = vmatpush3.msra.mxu0 %v952_v28  ;;  %3887 = vmatprep.subr.mxu1 %v4915_v5 }
 0x131   : > { %3854 = vmatprep.subr.mxu0 %v4915_v5  ;;  %3888 = vmatpush3.msra.mxu1 %v1039_v29 }
 0x132   : > { %3855 = vmatpush3.msra.mxu0 %v951_v30  ;;  %3889 = vmatprep.subr.mxu1 %v4915_v5 }
 0x133   : > { %3856 = vmatprep.subr.mxu0 %v4915_v5  ;;  %3890 = vmatpush3.msra.mxu1 %v1038_v31 }
 0x134   : > { %3857 = vmatpush3.msra.mxu0 %v950_v32  ;;  %3891 = vmatprep.subr.mxu1 %v4915_v5 }
 0x135   : > { %3858 = vmatprep.subr.mxu0 %v4915_v5  ;;  %3892 = vmatpush3.msra.mxu1 %v1037_v33 }
 0x136   : > { %3859 = vmatpush3.msra.mxu0 %v949_v34  ;;  %3893 = vmatprep.subr.mxu1 %v4915_v5 }
 0x137   : > { %3860 = vmatprep.subr.mxu0 %v4915_v5  ;;  %3894 = vmatpush3.msra.mxu1 %v1036_v35 }
 0x138   : > { %3861 = vmatpush3.msra.mxu0 %v948_v36  ;;  %3895 = vmatprep.subr.mxu1 %v4915_v5 }
 0x139   : > { %3862 = vmatprep.mubr.msk.f32.mxu0 %vm4916_vm0, %v4915_v5  ;;  %3896 = vmatpush3.msra.mxu1 %v1035_v37 }
 0x13a   : > { %3897 = vmatprep.mubr.msk.f32.mxu1 %vm4916_vm0, %v4915_v5  ;;  %3900 = vmatprep.subr.mxu0 %v4915_v5 }
 0x13b   : > { %3935 = vmatprep.subr.mxu1 %v4915_v5 }
 0x1a2   : > { %v913_v1 = vpop.xlane.xlu0 %912 }
 0x1a3   : > { %v915_v2 = vmul.f32 0.0078125, %v913_v1  ;;  %v1124_v1 = vld [vmem:[#allocation13 + $0x18] sm:$0xff] }
 0x1a5   : > { %v5369_v3 = vsub.f32 %v5365_v0, %v915_v2  ;;  %v1123_v2 = vld [vmem:[#allocation13 + $0x10] sm:$0xff] }
 0x1a7   : > { %v917_v4 = vmul.f32 %v5369_v3, %v5369_v3 }
 0x1a9   : > { %918 = vadd.xlane.f32.xlu0 %v917_v4  ;;  %v1121_v4 = vld [vmem:[#allocation13] sm:$0xff] }
 0x232   : > { %v919_v38 = vpop.xlane.xlu0 %918 }
 0x233   : > { %v920_v39 = vmul.f32 0.007874016, %v919_v38 }
 0x235   : > { %4387 = vrsqrt.f32 %v920_v39  ;;  %vm923_vm1 = vcmp.eq.f32.partialorder %v920_v39, inf  ;;  %v926_v42 = vand.u32 2147483648, %v920_v39  ;;  %vm925_vm2 = vcmp.eq.f32.partialorder %v920_v39, 0.0 }
 0x242   : > { %v4388_v40 = vpop.eup %4387 }
 0x243   : > { %v922_v41 = vmul.f32 %v4388_v40, %v920_v39 }
 0x245   : > { %v924_v43 = vsel %vm923_vm1, %v920_v39, %v922_v41 }
 0x246   : > { %v927_v44 = vsel %vm925_vm2, %v926_v42, %v924_v43 }
 0x247   : > { %v928_v45 = vadd.f32 1e-06, %v927_v44 }
 0x249   : > { %4389 = vrcp.f32 %v928_v45 }
 0x256   : > { %v4390_v46 = vpop.eup %4389 }
 0x257   : > { %v931_v48 = vmul.f32 %v4390_v46, %v5369_v3  ;;  %v1122_v3 = vld [vmem:[#allocation13 + $0x8] sm:$0xff] }
 0x259   : > { %v938_v50 = vmul.f32 %v3577_v47, %v931_v48 }
 0x25b   : > { %v946_v51 = vadd.f32 %v3578_v49, %v938_v50 }
 0x25d   : > { %3863 = vmatmul.mubr.f32.vlgmr.msra.gmra.mxu0 %v946_v51  ;;  %3898 = vmatmul.mubr.f32.vlgmr.msra.gmra.mxu1 %v946_v51 }
 0x25e   : > { %3901 = vmatpush3.msra.mxu0 %v1136_v52  ;;  %3932 = vmatprep.mubr.msk.f32.mxu0 %vm4916_vm0, %v4915_v5 }
 0x25f   : > { %3902 = vmatprep.subr.mxu0 %v4915_v5  ;;  %3937 = vmatprep.mubr.msk.f32.mxu1 %vm4916_vm0, %v4915_v5 }
 0x260   : > { %3903 = vmatpush3.msra.mxu0 %v1135_v53 }
 0x261   : > { %3904 = vmatprep.subr.mxu0 %v4915_v5 }
 0x262   : > { %3905 = vmatpush3.msra.mxu0 %v1134_v54 }
 0x263   : > { %3906 = vmatprep.subr.mxu0 %v4915_v5 }
 0x264   : > { %3907 = vmatpush3.msra.mxu0 %v1133_v55 }
 0x265   : > { %3908 = vmatprep.subr.mxu0 %v4915_v5 }
 0x266   : > { %3909 = vmatpush3.msra.mxu0 %v1132_v56 }
 0x267   : > { %3910 = vmatprep.subr.mxu0 %v4915_v5 }
 0x268   : > { %3911 = vmatpush3.msra.mxu0 %v1131_v57 }
 0x269   : > { %3912 = vmatprep.subr.mxu0 %v4915_v5 }
 0x26a   : > { %3913 = vmatpush3.msra.mxu0 %v1130_v58 }
 0x26b   : > { %3914 = vmatprep.subr.mxu0 %v4915_v5 }
 0x26c   : > { %3915 = vmatpush3.msra.mxu0 %v1129_v59 }
 0x26d   : > { %3916 = vmatprep.subr.mxu0 %v4915_v5 }
 0x26e   : > { %3917 = vmatpush3.msra.mxu0 %v1128_v60 }
 0x26f   : > { %3918 = vmatprep.subr.mxu0 %v4915_v5 }
 0x270   : > { %3919 = vmatpush3.msra.mxu0 %v1127_v61 }
 0x271   : > { %3920 = vmatprep.subr.mxu0 %v4915_v5 }
 0x272   : > { %3921 = vmatpush3.msra.mxu0 %v1126_v62 }
 0x273   : > { %3922 = vmatprep.subr.mxu0 %v4915_v5 }
 0x274   : > { %3923 = vmatpush3.msra.mxu0 %v1125_v63 }
 0x275   : > { %3924 = vmatprep.subr.mxu0 %v4915_v5 }
 0x276   : > { %3925 = vmatpush3.msra.mxu0 %v1124_v1 }
 0x277   : > { %3926 = vmatprep.subr.mxu0 %v4915_v5 }
 0x278   : > { %3927 = vmatpush3.msra.mxu0 %v1123_v2 }
 0x279   : > { %3928 = vmatprep.subr.mxu0 %v4915_v5 }
 0x27a   : > { %3929 = vmatpush3.msra.mxu0 %v1122_v3 }
 0x27b   : > { %3930 = vmatprep.subr.mxu0 %v4915_v5 }
 0x27c   : > { %3931 = vmatpush3.msra.mxu0 %v1121_v4 }
 0x27d   : > { %3933 = vmatmul.mubr.f32.vlgmr.msra.gmra.mxu0 %v946_v51  ;;  %3975 = vmatprep.subr.mxu0 %v4915_v5 }
 0x27e   : > { %4007 = vmatprep.mubr.msk.f32.mxu0 %vm4916_vm0, %v4915_v5 }
 0x31d   : > { %v1030_v6 = vpop.f32.mrf.mxu0  ;;  %v5440_v7 = vpop.f32.mrf.mxu1 }
 0x31e   : > { %v5442_v8 = vmul.f32 0.17677669, %v1030_v6  ;;  %1371 = vrot.lane.b32.xlu0 %v5440_v7, %s4917_s21  ;;  %3936 = vmatpush3.xpose.msk.msra.mxu1 %vm1207_vm3, %v5440_v7 }
 0x31f   : > { %v3864_v9 = vpop.f32.mrf.mxu0  ;;  %v3899_v10 = vpop.f32.mrf.mxu1  ;;  %3940 = vmatprep.subr.mxu1 %v4915_v5 }
 0x321   : > { %3938 = vmatmul.mubr.msk.f32.vlgmr.msra.gmra.mxu1 %vm1207_vm3, %v5442_v8 }
 0x322   : > { %3942 = vmatprep.mubr.msk.f32.mxu1 %vm4916_vm0, %v4915_v5 }
 0x33d   : > { %v5453_v11 = vpop.f32.mrf.mxu0 }
 0x33e   : > { %3941 = vmatpush3.msra.mxu1 %v5453_v11 }
 0x33f   : > { %v3934_v12 = vpop.f32.mrf.mxu0  ;;  %3945 = vmatprep.subr.mxu1 %v4915_v5 }
 0x390   : > { %v1372_v26 = vpop.permute.xlu0 %1371 }
 0x3e1   : > { %v1280_v14 = vpop.f32.mrf.mxu1 }
 0x3e2   : > { %v1281_v15 = vadd.f32 %v1280_v14, %v5457_v13 }
 0x3e3   : > { %v3939_v16 = vpop.f32.mrf.mxu1 }
 0x3e4   : > { %v1285_v17 = vsel %vm1284_vm4, %v1281_v15, -inf  ;;  %v1896_v16 = vld [vmem:[#allocation14 + $0x70] sm:$0xff] }
 0x3e5   : > { %1286 = vmax.xlane.f32.xlu1 %v1285_v17  ;;  %v1895_v17 = vld [vmem:[#allocation14 + $0x68] sm:$0xff] }
 0x46e   : > { %v1287_v18 = vpop.xlane.xlu1 %1286 }
 0x46f   : > { %v1288_v19 = vsub.f32 %v1281_v15, %v1287_v18  ;;  %v1897_v15 = vld [vmem:[#allocation14 + $0x78] sm:$0xff]  ;;  %v1894_v18 = vld [vmem:[#allocation14 + $0x60] sm:$0xff] }
 0x470   : > { %3976 = vmatpush3.msra.mxu0 %v1897_v15  ;;  %v2005_v15 = vld [vmem:[#allocation16 + $0x8] sm:$0xff] }
 0x471   : > { %v1289_v20 = vmul.f32 1.442695, %v1288_v19  ;;  %3977 = vmatprep.subr.mxu0 %v4915_v5  ;;  %v1893_v19 = vld [vmem:[#allocation14 + $0x58] sm:$0xff] }
 0x472   : > { %3978 = vmatpush3.msra.mxu0 %v1896_v16  ;;  %v2004_v16 = vld [vmem:[#allocation16] sm:$0xff] }
 0x473   : > { %4391 = vpow2.f32 %v1289_v20  ;;  %3979 = vmatprep.subr.mxu0 %v4915_v5  ;;  %v1892_v20 = vld [vmem:[#allocation14 + $0x50] sm:$0xff] }
 0x474   : > { %3980 = vmatpush3.msra.mxu0 %v1895_v17  ;;  %v2197_v17 = vld [vmem:[#allocation19 + $0x78] sm:$0xff] }
 0x475   : > { %3981 = vmatprep.subr.mxu0 %v4915_v5 }
 0x476   : > { %3982 = vmatpush3.msra.mxu0 %v1894_v18 }
 0x477   : > { %3983 = vmatprep.subr.mxu0 %v4915_v5 }
 0x478   : > { %3984 = vmatpush3.msra.mxu0 %v1893_v19 }
 0x479   : > { %3985 = vmatprep.subr.mxu0 %v4915_v5 }
 0x47a   : > { %3986 = vmatpush3.msra.mxu0 %v1892_v20 }
 0x47b   : > { %3987 = vmatprep.subr.mxu0 %v4915_v5 }
 0x480   : > { %v4392_v21 = vpop.eup %4391 }
 0x481   : > { %v1291_v22 = vsel %vm1284_vm4, %v4392_v21, 0.0 }
 0x482   : > { %1292 = vadd.xlane.f32.xlu1 %v1291_v22  ;;  %v1890_v22 = vld [vmem:[#allocation14 + $0x40] sm:$0xff] }
 0x493   : > { %1369 = vrot.lane.b32.xlu1 %v5442_v8, %s4917_s21 }
 0x50b   : > { %v1293_v23 = vpop.xlane.xlu1 %1292 }
 0x50c   : > { %4393 = vrcp.f32 %v1293_v23  ;;  %v1889_v23 = vld [vmem:[#allocation14 + $0x38] sm:$0xff] }
 0x50f   : > { %v1370_v27 = vpop.permute.xlu1 %1369 }
 0x519   : > { %v4394_v24 = vpop.eup %4393 }
 0x51a   : > { %v1295_v25 = vmul.f32 %v4394_v24, %v4392_v21  ;;  %v1891_v21 = vld [vmem:[#allocation14 + $0x48] sm:$0xff]  ;;  %v1888_v24 = vld [vmem:[#allocation14 + $0x30] sm:$0xff] }
 0x51b   : > { %3988 = vmatpush3.msra.mxu0 %v1891_v21 }
 0x51c   : > { %3943 = vmatmul.mubr.msk.f32.vlgmr.msra.gmra.mxu1 %vm1284_vm4, %v1295_v25  ;;  %3989 = vmatprep.subr.mxu0 %v4915_v5  ;;  %v1887_v25 = vld [vmem:[#allocation14 + $0x28] sm:$0xff] }
 0x51d   : > { %3946 = vmatpush3.xpose.msk.msra.mxu1 %vm1207_vm3, %v1372_v26  ;;  %3947 = vmatprep.mubr.msk.f32.mxu1 %vm4916_vm0, %v4915_v5  ;;  %v1886_v26 = vld [vmem:[#allocation14 + $0x20] sm:$0xff] }
 0x51e   : > { %3950 = vmatprep.subr.mxu1 %v4915_v5  ;;  %3990 = vmatpush3.msra.mxu0 %v1890_v22 }
 0x51f   : > { %3991 = vmatprep.subr.mxu0 %v4915_v5 }
 0x520   : > { %3948 = vmatmul.mubr.msk.f32.vlgmr.msra.gmra.mxu1 %vm1207_vm3, %v1370_v27  ;;  %3992 = vmatpush3.msra.mxu0 %v1889_v23  ;;  %v1885_v27 = vld [vmem:[#allocation14 + $0x18] sm:$0xff] }
 0x521   : > { %3952 = vmatprep.mubr.msk.f32.mxu1 %vm4916_vm0, %v4915_v5  ;;  %3993 = vmatprep.subr.mxu0 %v4915_v5 }
 0x522   : > { %3994 = vmatpush3.msra.mxu0 %v1888_v24 }
 0x523   : > { %3995 = vmatprep.subr.mxu0 %v4915_v5 }
 0x524   : > { %3996 = vmatpush3.msra.mxu0 %v1887_v25 }
 0x525   : > { %3997 = vmatprep.subr.mxu0 %v4915_v5 }
 0x526   : > { %3998 = vmatpush3.msra.mxu0 %v1886_v26 }
 0x527   : > { %3999 = vmatprep.subr.mxu0 %v4915_v5 }
 0x528   : > { %4000 = vmatpush3.msra.mxu0 %v1885_v27  ;;  %v3591_v27 = vld [vmem:[%s5783_s10] ss:$0 sm:$0xff] }
 0x529   : > { %4001 = vmatprep.subr.mxu0 %v4915_v5 }
 0x5dc   : > { %v5472_v28 = vpop.f32.mrf.mxu1 }
 0x5de   : > { %v3944_v29 = vpop.f32.mrf.mxu1 }
 0x5df   : > { %v1884_v29 = vld [vmem:[#allocation14 + $0x10] sm:$0xff] }
 0x5e0   : > { %v1443_v30 = vpop.f32.mrf.mxu1  ;;  %4002 = vmatpush3.msra.mxu0 %v1884_v29 }
 0x5e1   : > { %v1444_v31 = vadd.f32 %v1443_v30, %v5457_v13  ;;  %v1883_v30 = vld [vmem:[#allocation14 + $0x8] sm:$0xff]  ;;  %4003 = vmatprep.subr.mxu0 %v4915_v5 }
 0x5e2   : > { %v3949_v32 = vpop.f32.mrf.mxu1  ;;  %4004 = vmatpush3.msra.mxu0 %v1883_v30  ;;  %v3592_v30 = vld [vmem:[%s5784_s11] ss:$0 sm:$0xff] }
 0x5e3   : > { %v1447_v33 = vsel %vm1284_vm4, %v1444_v31, -inf  ;;  %4005 = vmatprep.subr.mxu0 %v4915_v5 }
 0x5e4   : > { %1448 = vmax.xlane.f32.xlu1 %v1447_v33 }
 0x5f5   : > { %1537 = vrot.lane.b32.xlu1 %v5440_v7, %s4918_s22 }
 0x5f9   : > { %1535 = vrot.lane.b32.xlu1 %v5442_v8, %s4918_s22 }
 0x66d   : > { %v1449_v34 = vpop.xlane.xlu1 %1448 }
 0x66e   : > { %v1450_v35 = vsub.f32 %v1444_v31, %v1449_v34  ;;  %v1882_v31 = vld [vmem:[#allocation14] sm:$0xff] }
 0x66f   : > { %4006 = vmatpush3.msra.mxu0 %v1882_v31 }
 0x670   : > { %v1451_v36 = vmul.f32 1.442695, %v1450_v35 }
 0x671   : > { %v1538_v42 = vpop.permute.xlu1 %1537 }
 0x672   : > { %4395 = vpow2.f32 %v1451_v36 }
 0x675   : > { %v1536_v44 = vpop.permute.xlu1 %1535 }
 0x67f   : > { %v4396_v37 = vpop.eup %4395 }
 0x680   : > { %v1453_v38 = vsel %vm1284_vm4, %v4396_v37, 0.0 }
 0x681   : > { %1454 = vadd.xlane.f32.xlu0 %v1453_v38 }
 0x697   : > { %1459 = vrot.lane.b32.xlu0 %v5453_v11, %s4917_s21 }
 0x70a   : > { %v1455_v39 = vpop.xlane.xlu0 %1454 }
 0x70b   : > { %4397 = vrcp.f32 %v1455_v39 }
 0x70e   : > { %v1460_v40 = vpop.permute.xlu0 %1459 }
 0x70f   : > { %3951 = vmatpush3.msra.mxu1 %v1460_v40 }
 0x710   : > { %3955 = vmatprep.subr.mxu1 %v4915_v5 }
 0x718   : > { %v4398_v41 = vpop.eup %4397 }
 0x719   : > { %v1457_v43 = vmul.f32 %v4398_v41, %v4396_v37 }
 0x71b   : > { %3953 = vmatmul.mubr.msk.f32.vlgmr.msra.gmra.mxu1 %vm1284_vm4, %v1457_v43 }
 0x71c   : > { %3956 = vmatpush3.xpose.msk.msra.mxu1 %vm1207_vm3, %v1538_v42  ;;  %3957 = vmatprep.mubr.msk.f32.mxu1 %vm4916_vm0, %v4915_v5 }
 0x71d   : > { %3960 = vmatprep.subr.mxu1 %v4915_v5 }
 0x71f   : > { %3958 = vmatmul.mubr.msk.f32.vlgmr.msra.gmra.mxu1 %vm1207_vm3, %v1536_v44 }
 0x720   : > { %3962 = vmatprep.mubr.msk.f32.mxu1 %vm4916_vm0, %v4915_v5 }
 0x7db   : > { %v1531_v45 = vpop.f32.mrf.mxu1 }
 0x7dd   : > { %v3954_v46 = vpop.f32.mrf.mxu1 }
 0x7de   : > { %v2106_v46 = vld [vmem:[#allocation17 + $0x78] sm:$0xff] }
 0x7df   : > { %v1609_v47 = vpop.f32.mrf.mxu1  ;;  %4045 = vmatprep.subr.mxu0 %v2106_v46 }
 0x7e0   : > { %v1610_v48 = vadd.f32 %v1609_v47, %v5457_v13  ;;  %v2105_v47 = vld [vmem:[#allocation17 + $0x70] sm:$0xff] }
 0x7e1   : > { %v3959_v49 = vpop.f32.mrf.mxu1 }
 0x7e2   : > { %v1613_v50 = vsel %vm1284_vm4, %v1610_v48, -inf  ;;  %v2102_v49 = vld [vmem:[#allocation17 + $0x58] sm:$0xff] }
 0x7e3   : > { %1614 = vmax.xlane.f32.xlu1 %v1613_v50  ;;  %v2019_v50 = vld [vmem:[#allocation16 + $0x78] sm:$0xff] }
 0x7f4   : > { %1702 = vrot.lane.b32.xlu1 %v5440_v7, %s4919_s13 }
 0x7f8   : > { %1700 = vrot.lane.b32.xlu1 %v5442_v8, %s4919_s13 }
 0x86c   : > { %v1615_v51 = vpop.xlane.xlu1 %1614 }
 0x86d   : > { %v1616_v52 = vsub.f32 %v1610_v48, %v1615_v51  ;;  %v2103_v48 = vld [vmem:[#allocation17 + $0x60] sm:$0xff]  ;;  %v2101_v51 = vld [vmem:[#allocation17 + $0x50] sm:$0xff] }
 0x86f   : > { %v1617_v53 = vmul.f32 1.442695, %v1616_v52  ;;  %v2018_v52 = vld [vmem:[#allocation16 + $0x70] sm:$0xff] }
 0x870   : > { %v1703_v59 = vpop.permute.xlu1 %1702 }
 0x871   : > { %4399 = vpow2.f32 %v1617_v53  ;;  %v2100_v53 = vld [vmem:[#allocation17 + $0x48] sm:$0xff] }
 0x874   : > { %v1701_v61 = vpop.permute.xlu1 %1700 }
 0x87e   : > { %v4400_v54 = vpop.eup %4399 }
 0x87f   : > { %v1619_v55 = vsel %vm1284_vm4, %v4400_v54, 0.0 }
 0x880   : > { %1620 = vadd.xlane.f32.xlu0 %v1619_v55  ;;  %v2099_v55 = vld [vmem:[#allocation17 + $0x40] sm:$0xff] }
 0x896   : > { %1624 = vrot.lane.b32.xlu0 %v5453_v11, %s4918_s22 }
 0x909   : > { %v1621_v56 = vpop.xlane.xlu0 %1620 }
 0x90a   : > { %4401 = vrcp.f32 %v1621_v56  ;;  %v2016_v56 = vld [vmem:[#allocation16 + $0x60] sm:$0xff] }
 0x90d   : > { %v1625_v57 = vpop.permute.xlu0 %1624 }
 0x90e   : > { %3961 = vmatpush3.msra.mxu1 %v1625_v57  ;;  %v2098_v57 = vld [vmem:[#allocation17 + $0x38] sm:$0xff] }
 0x90f   : > { %3965 = vmatprep.subr.mxu1 %v4915_v5 }
 0x917   : > { %v4402_v58 = vpop.eup %4401 }
 0x918   : > { %v1623_v60 = vmul.f32 %v4402_v58, %v4400_v54  ;;  %v2017_v54 = vld [vmem:[#allocation16 + $0x68] sm:$0xff]  ;;  %v2015_v58 = vld [vmem:[#allocation16 + $0x58] sm:$0xff] }
 0x91a   : > { %3963 = vmatmul.mubr.msk.f32.vlgmr.msra.gmra.mxu1 %vm1284_vm4, %v1623_v60  ;;  %v2014_v60 = vld [vmem:[#allocation16 + $0x50] sm:$0xff] }
 0x91b   : > { %3966 = vmatpush3.xpose.msk.msra.mxu1 %vm1207_vm3, %v1703_v59  ;;  %3967 = vmatprep.mubr.msk.f32.mxu1 %vm4916_vm0, %v4915_v5  ;;  %v2097_v59 = vld [vmem:[#allocation17 + $0x30] sm:$0xff] }
 0x91c   : > { %3970 = vmatprep.subr.mxu1 %v4915_v5 }
 0x91e   : > { %3968 = vmatmul.mubr.msk.f32.vlgmr.msra.gmra.mxu1 %vm1207_vm3, %v1701_v61  ;;  %v2096_v61 = vld [vmem:[#allocation17 + $0x28] sm:$0xff] }
 0x91f   : > { %3972 = vmatprep.mubr.msk.f32.mxu1 %vm4916_vm0, %v4915_v5 }
 0x9da   : > { %v1696_v62 = vpop.f32.mrf.mxu1 }
 0x9dc   : > { %v3964_v63 = vpop.f32.mrf.mxu1 }
 0x9dd   : > { %v2095_v63 = vld [vmem:[#allocation17 + $0x20] sm:$0xff] }
 0x9de   : > { %v1774_v1 = vpop.f32.mrf.mxu1 }
 0x9df   : > { %v1775_v2 = vadd.f32 %v1774_v1, %v5457_v13  ;;  %v2012_v1 = vld [vmem:[#allocation16 + $0x40] sm:$0xff] }
 0x9e0   : > { %v3969_v3 = vpop.f32.mrf.mxu1 }
 0x9e1   : > { %v1778_v4 = vsel %vm1284_vm4, %v1775_v2, -inf  ;;  %v2011_v3 = vld [vmem:[#allocation16 + $0x38] sm:$0xff] }
 0x9e2   : > { %1779 = vmax.xlane.f32.xlu0 %v1778_v4  ;;  %v2093_v4 = vld [vmem:[#allocation17 + $0x10] sm:$0xff] }
 0x9f8   : > { %1789 = vrot.lane.b32.xlu0 %v5453_v11, %s4919_s13 }
 0x9fc   : > { %1870 = vrot.lane.b32.xlu0 %v1696_v62, %s4918_s22  ;;  %v2013_v62 = vld [vmem:[#allocation16 + $0x48] sm:$0xff] }
 0xa6b   : > { %v1780_v6 = vpop.xlane.xlu0 %1779 }
 0xa6c   : > { %v1781_v7 = vsub.f32 %v1775_v2, %v1780_v6  ;;  %v2094_v2 = vld [vmem:[#allocation17 + $0x18] sm:$0xff]  ;;  %v2010_v6 = vld [vmem:[#allocation16 + $0x30] sm:$0xff] }
 0xa6e   : > { %v1782_v8 = vmul.f32 1.442695, %v1781_v7  ;;  %v2092_v7 = vld [vmem:[#allocation17 + $0x8] sm:$0xff] }
 0xa6f   : > { %v1790_v9 = vpop.permute.xlu0 %1789 }
 0xa70   : > { %4403 = vpow2.f32 %v1782_v8  ;;  %3971 = vmatpush3.msra.mxu1 %v1790_v9  ;;  %v2009_v8 = vld [vmem:[#allocation16 + $0x28] sm:$0xff]  ;;  %v2091_v9 = vld [vmem:[#allocation17] sm:$0xff] }
 0xa71   : > { %4010 = vmatprep.subr.mxu1 %v4915_v5 }
 0xa73   : > { %v1871_v36 = vpop.permute.xlu0 %1870 }
 0xa7d   : > { %v4404_v10 = vpop.eup %4403 }
 0xa7e   : > { %v1784_v12 = vsel %vm1284_vm4, %v4404_v10, 0.0 }
 0xa7f   : > { %1785 = vadd.xlane.f32.xlu1 %v1784_v12  ;;  %v910_v12 = vld [vmem:[%s5331_s4] sm:$0xff] }
 0xa90   : > { %1866 = vrot.lane.b32.xlu1 %v1531_v45, %s4919_s13 }
 0xb08   : > { %v1786_v13 = vpop.xlane.xlu1 %1785 }
 0xb09   : > { %4405 = vrcp.f32 %v1786_v13  ;;  %v5562_v13 = vld [vmem:[%s5331_s4 + $0x8] sm:$0xff] }
 0xb0c   : > { %v1867_v34 = vpop.permute.xlu1 %1866 }
 0xb0d   : > { %v1877_v35 = vsel %vm1207_vm3, %v5472_v28, %v1867_v34  ;;  %v2195_v34 = vld [vmem:[#allocation19 + $0x68] sm:$0xff] }
 0xb0e   : > { %v1879_v37 = vsel %vm1878_vm5, %v1877_v35, %v1871_v36  ;;  %v2194_v35 = vld [vmem:[#allocation19 + $0x60] sm:$0xff]  ;;  %v2193_v36 = vld [vmem:[#allocation19 + $0x58] sm:$0xff] }
 0xb16   : > { %v4406_v14 = vpop.eup %4405 }
 0xb17   : > { %v1788_v11 = vmul.f32 %v4406_v14, %v4404_v10  ;;  %v2008_v10 = vld [vmem:[#allocation16 + $0x20] sm:$0xff]  ;;  %v2007_v14 = vld [vmem:[#allocation16 + $0x18] sm:$0xff] }
 0xb19   : > { %3973 = vmatmul.mubr.msk.f32.vlgmr.msra.gmra.mxu1 %vm1284_vm4, %v1788_v11  ;;  %v2006_v11 = vld [vmem:[#allocation16 + $0x10] sm:$0xff] }
 0xb1a   : > { %4042 = vmatprep.mubr.msk.f32.mxu1 %vm4916_vm0, %v4915_v5  ;;  %4011 = vmatpush3.msra.mxu1 %v2019_v50 }
 0xb1b   : > { %4012 = vmatprep.subr.mxu1 %v4915_v5 }
 0xb1c   : > { %4013 = vmatpush3.msra.mxu1 %v2018_v52 }
 0xb1d   : > { %4014 = vmatprep.subr.mxu1 %v4915_v5 }
 0xb1e   : > { %4015 = vmatpush3.msra.mxu1 %v2017_v54  ;;  %v5618_v54 = vld [vmem:[#allocation8] sm:$0xff] }
 0xb1f   : > { %4016 = vmatprep.subr.mxu1 %v4915_v5 }
 0xb20   : > { %4017 = vmatpush3.msra.mxu1 %v2016_v56 }
 0xb21   : > { %4018 = vmatprep.subr.mxu1 %v4915_v5 }
 0xb22   : > { %4019 = vmatpush3.msra.mxu1 %v2015_v58 }
 0xb23   : > { %4020 = vmatprep.subr.mxu1 %v4915_v5 }
 0xb24   : > { %4021 = vmatpush3.msra.mxu1 %v2014_v60 }
 0xb25   : > { %4022 = vmatprep.subr.mxu1 %v4915_v5 }
 0xb26   : > { %4023 = vmatpush3.msra.mxu1 %v2013_v62 }
 0xb27   : > { %4024 = vmatprep.subr.mxu1 %v4915_v5 }
 0xb28   : > { %4025 = vmatpush3.msra.mxu1 %v2012_v1 }
 0xb29   : > { %4026 = vmatprep.subr.mxu1 %v4915_v5 }
 0xb2a   : > { %4027 = vmatpush3.msra.mxu1 %v2011_v3 }
 0xb2b   : > { %4028 = vmatprep.subr.mxu1 %v4915_v5 }
 0xb2c   : > { %4029 = vmatpush3.msra.mxu1 %v2010_v6 }
 0xb2d   : > { %4030 = vmatprep.subr.mxu1 %v4915_v5 }
 0xb2e   : > { %4031 = vmatpush3.msra.mxu1 %v2009_v8 }
 0xb2f   : > { %4032 = vmatprep.subr.mxu1 %v4915_v5 }
 0xb30   : > { %4033 = vmatpush3.msra.mxu1 %v2008_v10 }
 0xb31   : > { %4034 = vmatprep.subr.mxu1 %v4915_v5 }
 0xb32   : > { %4035 = vmatpush3.msra.mxu1 %v2007_v14 }
 0xb33   : > { %4036 = vmatprep.subr.mxu1 %v4915_v5 }
 0xb34   : > { %4037 = vmatpush3.msra.mxu1 %v2006_v11 }
 0xb35   : > { %4038 = vmatprep.subr.mxu1 %v4915_v5 }
 0xb36   : > { %4039 = vmatpush3.msra.mxu1 %v2005_v15 }
 0xb37   : > { %4040 = vmatprep.subr.mxu1 %v4915_v5 }
 0xb38   : > { %4041 = vmatpush3.msra.mxu1 %v2004_v16 }
 0xb39   : > { %4080 = vmatprep.subr.mxu1 %v2197_v17 }
 0xbd9   : > { %v1861_v32 = vpop.f32.mrf.mxu1 }
 0xbda   : > { %1874 = vrot.lane.b32.xlu1 %v1861_v32, %s4917_s21 }
 0xbdb   : > { %v3974_v33 = vpop.f32.mrf.mxu1 }
 0xbdc   : > { %v2196_v33 = vld [vmem:[#allocation19 + $0x70] sm:$0xff] }
 0xc4c   : > { %v1875_v38 = vpop.permute.xlu1 %1874 }
 0xc4d   : > { %v1881_v39 = vsel %vm1880_vm6, %v1879_v37, %v1875_v38  ;;  %v2192_v37 = vld [vmem:[#allocation19 + $0x50] sm:$0xff]  ;;  %v2191_v38 = vld [vmem:[#allocation19 + $0x48] sm:$0xff] }
 0xc4e   : > { %4008 = vmatmul.mubr.f32.vlgmr.msra.gmra.mxu0 %v1881_v39  ;;  %v2190_v39 = vld [vmem:[#allocation19 + $0x40] sm:$0xff] }
 0xc4f   : > { %4046 = vmatpush3.msra.mxu0 %v2106_v46  ;;  %4077 = vmatprep.mubr.f32.mxu0 %v910_v12  ;;  %v2183_v46 = vld [vmem:[#allocation19 + $0x8] sm:$0xff] }
 0xc50   : > { %4047 = vmatprep.subr.mxu0 %v2105_v47 }
 0xc51   : > { %4048 = vmatpush3.msra.mxu0 %v2105_v47  ;;  %v2182_v47 = vld [vmem:[#allocation19] sm:$0xff] }
 0xd0e   : > { %v1964_v40 = vpop.f32.mrf.mxu0 }
 0xd0f   : > { %v5542_v41 = vadd.f32 %v1964_v40, %v5365_v0  ;;  %v2104_v0 = vld [vmem:[#allocation17 + $0x68] sm:$0xff]  ;;  %v2189_v40 = vld [vmem:[#allocation19 + $0x38] sm:$0xff] }
 0xd10   : > { %v4009_v42 = vpop.f32.mrf.mxu0  ;;  %4049 = vmatprep.subr.mxu0 %v2104_v0 }
 0xd11   : > { %1969 = vadd.xlane.f32.xlu0 %v5542_v41  ;;  %4050 = vmatpush3.msra.mxu0 %v2104_v0  ;;  %v2188_v42 = vld [vmem:[#allocation19 + $0x30] sm:$0xff] }
 0xd12   : > { %4051 = vmatprep.subr.mxu0 %v2103_v48 }
 0xd13   : > { %4052 = vmatpush3.msra.mxu0 %v2103_v48 }
 0xd14   : > { %4053 = vmatprep.subr.mxu0 %v2102_v49 }
 0xd15   : > { %4054 = vmatpush3.msra.mxu0 %v2102_v49 }
 0xd16   : > { %4055 = vmatprep.subr.mxu0 %v2101_v51 }
 0xd17   : > { %4056 = vmatpush3.msra.mxu0 %v2101_v51 }
 0xd18   : > { %4057 = vmatprep.subr.mxu0 %v2100_v53 }
 0xd19   : > { %4058 = vmatpush3.msra.mxu0 %v2100_v53 }
 0xd1a   : > { %4059 = vmatprep.subr.mxu0 %v2099_v55 }
 0xd1b   : > { %4060 = vmatpush3.msra.mxu0 %v2099_v55 }
 0xd1c   : > { %4061 = vmatprep.subr.mxu0 %v2098_v57 }
 0xd1d   : > { %4062 = vmatpush3.msra.mxu0 %v2098_v57 }
 0xd1e   : > { %4063 = vmatprep.subr.mxu0 %v2097_v59 }
 0xd1f   : > { %4064 = vmatpush3.msra.mxu0 %v2097_v59 }
 0xd20   : > { %4065 = vmatprep.subr.mxu0 %v2096_v61 }
 0xd21   : > { %4066 = vmatpush3.msra.mxu0 %v2096_v61 }
 0xd22   : > { %4067 = vmatprep.subr.mxu0 %v2095_v63 }
 0xd23   : > { %4068 = vmatpush3.msra.mxu0 %v2095_v63 }
 0xd24   : > { %4069 = vmatprep.subr.mxu0 %v2094_v2 }
 0xd25   : > { %4070 = vmatpush3.msra.mxu0 %v2094_v2 }
 0xd26   : > { %4071 = vmatprep.subr.mxu0 %v2093_v4 }
 0xd27   : > { %4072 = vmatpush3.msra.mxu0 %v2093_v4 }
 0xd28   : > { %4073 = vmatprep.subr.mxu0 %v2092_v7 }
 0xd29   : > { %4074 = vmatpush3.msra.mxu0 %v2092_v7 }
 0xd2a   : > { %4075 = vmatprep.subr.mxu0 %v2091_v9 }
 0xd2b   : > { %4076 = vmatpush3.msra.mxu0 %v2091_v9 }
 0xd2c   : > { %4078 = vmatmul.mubr.f32.vlgmr.msra.gmra.mxu0 %v5562_v13  ;;  %4136 = vmatprep.subr.mxu0 %v4915_v5 }
 0xd2d   : > { %4140 = vmatprep.mubr.msk.f32.mxu0 %vm4916_vm0, %v4915_v5 }
 0xd9a   : > { %v1970_v43 = vpop.xlane.xlu0 %1969 }
 0xd9b   : > { %v1971_v44 = vmul.f32 0.0078125, %v1970_v43  ;;  %v2187_v43 = vld [vmem:[#allocation19 + $0x28] sm:$0xff] }
 0xd9d   : > { %v5546_v28 = vsub.f32 %v5542_v41, %v1971_v44  ;;  %v2186_v44 = vld [vmem:[#allocation19 + $0x20] sm:$0xff] }
 0xd9f   : > { %v1973_v45 = vmul.f32 %v5546_v28, %v5546_v28 }
 0xda1   : > { %1974 = vadd.xlane.f32.xlu1 %v1973_v45  ;;  %v2184_v45 = vld [vmem:[#allocation19 + $0x10] sm:$0xff] }
 0xdec   : > { %v5584_v0 = vpop.f32.mrf.mxu0 }
 0xdee   : > { %v5588_v48 = vpop.f32.mrf.mxu0 }
 0xdef   : > { %2439 = vrot.lane.b32.xlu1 %v5588_v48, %s4917_s21 }
 0xe2a   : > { %v1975_v18 = vpop.xlane.xlu1 %1974 }
 0xe2b   : > { %v1976_v19 = vmul.f32 0.007874016, %v1975_v18 }
 0xe2d   : > { %4407 = vrsqrt.f32 %v1976_v19  ;;  %vm1979_vm7 = vcmp.eq.f32.partialorder %v1976_v19, inf  ;;  %v1982_v22 = vand.u32 2147483648, %v1976_v19  ;;  %vm1981_vm8 = vcmp.eq.f32.partialorder %v1976_v19, 0.0 }
 0xe3a   : > { %v4408_v20 = vpop.eup %4407 }
 0xe3b   : > { %v1978_v21 = vmul.f32 %v4408_v20, %v1976_v19 }
 0xe3d   : > { %v1980_v23 = vsel %vm1979_vm7, %v1976_v19, %v1978_v21 }
 0xe3e   : > { %v1983_v24 = vsel %vm1981_vm8, %v1982_v22, %v1980_v23 }
 0xe3f   : > { %v1984_v25 = vadd.f32 1e-06, %v1983_v24 }
 0xe41   : > { %4409 = vrcp.f32 %v1984_v25 }
 0xe4e   : > { %v4410_v26 = vpop.eup %4409 }
 0xe4f   : > { %v1987_v29 = vmul.f32 %v4410_v26, %v5546_v28  ;;  %v2185_v28 = vld [vmem:[#allocation19 + $0x18] sm:$0xff] }
 0xe51   : > { %v1994_v31 = vmul.f32 %v3591_v27, %v1987_v29 }
 0xe53   : > { %v2002_v32 = vadd.f32 %v3592_v30, %v1994_v31 }
 0xe55   : > { %4043 = vmatmul.mubr.f32.vlgmr.msra.gmra.mxu1 %v2002_v32 }
 0xe56   : > { %4081 = vmatpush3.msra.mxu1 %v2197_v17  ;;  %4112 = vmatprep.mubr.f32.mxu1 %v910_v12 }
 0xe57   : > { %4082 = vmatprep.subr.mxu1 %v2196_v33 }
 0xe58   : > { %4083 = vmatpush3.msra.mxu1 %v2196_v33 }
 0xe59   : > { %4084 = vmatprep.subr.mxu1 %v2195_v34 }
 0xe5a   : > { %4085 = vmatpush3.msra.mxu1 %v2195_v34 }
 0xe5b   : > { %4086 = vmatprep.subr.mxu1 %v2194_v35 }
 0xe5c   : > { %4087 = vmatpush3.msra.mxu1 %v2194_v35 }
 0xe5d   : > { %4088 = vmatprep.subr.mxu1 %v2193_v36 }
 0xe5e   : > { %4089 = vmatpush3.msra.mxu1 %v2193_v36 }
 0xe5f   : > { %4090 = vmatprep.subr.mxu1 %v2192_v37 }
 0xe60   : > { %4091 = vmatpush3.msra.mxu1 %v2192_v37 }
 0xe61   : > { %4092 = vmatprep.subr.mxu1 %v2191_v38  ;;  %v2440_v3 = vpop.permute.xlu1 %2439 }
 0xe62   : > { %4093 = vmatpush3.msra.mxu1 %v2191_v38 }
 0xe63   : > { %4094 = vmatprep.subr.mxu1 %v2190_v39 }
 0xe64   : > { %4095 = vmatpush3.msra.mxu1 %v2190_v39 }
 0xe65   : > { %4096 = vmatprep.subr.mxu1 %v2189_v40 }
 0xe66   : > { %4097 = vmatpush3.msra.mxu1 %v2189_v40 }
 0xe67   : > { %4098 = vmatprep.subr.mxu1 %v2188_v42 }
 0xe68   : > { %4099 = vmatpush3.msra.mxu1 %v2188_v42 }
 0xe69   : > { %4100 = vmatprep.subr.mxu1 %v2187_v43 }
 0xe6a   : > { %4101 = vmatpush3.msra.mxu1 %v2187_v43 }
 0xe6b   : > { %4102 = vmatprep.subr.mxu1 %v2186_v44 }
 0xe6c   : > { %4103 = vmatpush3.msra.mxu1 %v2186_v44 }
 0xe6d   : > { %4104 = vmatprep.subr.mxu1 %v2185_v28 }
 0xe6e   : > { %4105 = vmatpush3.msra.mxu1 %v2185_v28 }
 0xe6f   : > { %4106 = vmatprep.subr.mxu1 %v2184_v45 }
 0xe70   : > { %4107 = vmatpush3.msra.mxu1 %v2184_v45 }
 0xe71   : > { %4108 = vmatprep.subr.mxu1 %v2183_v46 }
 0xe72   : > { %4109 = vmatpush3.msra.mxu1 %v2183_v46 }
 0xe73   : > { %4110 = vmatprep.subr.mxu1 %v2182_v47 }
 0xe74   : > { %4111 = vmatpush3.msra.mxu1 %v2182_v47 }
 0xe75   : > { %4115 = vmatprep.subr.mxu1 %v4915_v5  ;;  %4113 = vmatmul.mubr.f32.vlgmr.msra.gmra.mxu1 %v5562_v13 }
 0xe76   : > { %4119 = vmatprep.mubr.msk.f32.mxu1 %vm4916_vm0, %v4915_v5  ;;  %4116 = vmatpush3.xpose.msk.msra.mxu1 %vm1207_vm3, %v5584_v0 }
 0xe77   : > { %4117 = vmatprep.subr.mxu1 %v4915_v5 }
 0xe7a   : > { %4118 = vmatpush3.xpose.msk.msra.mxu1 %vm1207_vm3, %v5588_v48 }
 0xe7b   : > { %4122 = vmatprep.subr.mxu1 %v4915_v5 }
 0xf15   : > { %v2086_v49 = vpop.f32.mrf.mxu1 }
 0xf16   : > { %v5596_v50 = vmul.f32 0.17677669, %v2086_v49 }
 0xf17   : > { %v4044_v51 = vpop.f32.mrf.mxu1 }
 0xf18   : > { %2437 = vrot.lane.b32.xlu1 %v5596_v50, %s4917_s21  ;;  %4120 = vmatmul.mubr.msk.f32.vlgmr.msra.gmra.mxu1 %vm1207_vm3, %v5596_v50 }
 0xf19   : > { %4126 = vmatprep.mubr.msk.f32.mxu1 %vm4916_vm0, %v4915_v5 }
 0xf1c   : > { %2615 = vrot.lane.b32.xlu1 %v5584_v0, %s4918_s22 }
 0xf20   : > { %2611 = vrot.lane.b32.xlu1 %v5596_v50, %s4918_s22 }
 0xf35   : > { %v5608_v52 = vpop.f32.mrf.mxu1 }
 0xf36   : > { %4123 = vmatpush3.msra.mxu1 %v5608_v52 }
 0xf37   : > { %v5611_v53 = vpop.f32.mrf.mxu1  ;;  %4124 = vmatprep.subr.mxu1 %v4915_v5 }
 0xf38   : > { %2704 = vrot.lane.b32.xlu1 %v5611_v53, %s4918_s22  ;;  %4125 = vmatpush3.msra.mxu1 %v5611_v53 }
 0xf39   : > { %4129 = vmatprep.subr.mxu1 %v4915_v5 }
 0xf8a   : > { %v2438_v7 = vpop.permute.xlu1 %2437 }
 0xf8e   : > { %v2616_v8 = vpop.permute.xlu1 %2615 }
 0xf92   : > { %v2612_v10 = vpop.permute.xlu1 %2611 }
 0xfaa   : > { %v2705_v23 = vpop.permute.xlu1 %2704 }
 0xfd8   : > { %v2348_v55 = vpop.f32.mrf.mxu1 }
 0xfd9   : > { %v2349_v56 = vadd.f32 %v2348_v55, %v5618_v54 }
 0xfda   : > { %v4121_v57 = vpop.f32.mrf.mxu1 }
 0xfdb   : > { %v2353_v58 = vsel %vm2352_vm9, %v2349_v56, -inf }
 0xfdc   : > { %2354 = vmax.xlane.f32.xlu0 %v2353_v58 }
0x1065   : > { %v2355_v59 = vpop.xlane.xlu0 %2354 }
0x1066   : > { %v2356_v60 = vsub.f32 %v2349_v56, %v2355_v59 }
0x1068   : > { %v2357_v61 = vmul.f32 1.442695, %v2356_v60  ;;  %v2985_v60 = vld [vmem:[#allocation20 + $0x78] sm:$0xff] }
0x106a   : > { %4411 = vpow2.f32 %v2357_v61  ;;  %v2984_v61 = vld [vmem:[#allocation20 + $0x70] sm:$0xff] }
0x1077   : > { %v4412_v62 = vpop.eup %4411 }
0x1078   : > { %v2359_v63 = vsel %vm2352_vm9, %v4412_v62, 0.0 }
0x1079   : > { %2360 = vadd.xlane.f32.xlu0 %v2359_v63  ;;  %v2982_v63 = vld [vmem:[#allocation20 + $0x60] sm:$0xff] }
0x108f   : > { %2441 = vrot.lane.b32.xlu0 %v5584_v0, %s4917_s21 }
0x1093   : > { %2613 = vrot.lane.b32.xlu0 %v5588_v48, %s4918_s22 }
0x1102   : > { %v2361_v1 = vpop.xlane.xlu0 %2360 }
0x1103   : > { %4413 = vrcp.f32 %v2361_v1  ;;  %v2981_v1 = vld [vmem:[#allocation20 + $0x58] sm:$0xff] }
0x1106   : > { %v2442_v6 = vpop.permute.xlu0 %2441 }
0x110a   : > { %v2614_v9 = vpop.permute.xlu0 %2613 }
0x1110   : > { %v4414_v2 = vpop.eup %4413 }
0x1111   : > { %v2363_v4 = vmul.f32 %v4414_v2, %v4412_v62  ;;  %v2983_v62 = vld [vmem:[#allocation20 + $0x68] sm:$0xff]  ;;  %v2980_v2 = vld [vmem:[#allocation20 + $0x50] sm:$0xff] }
0x1113   : > { %4127 = vmatmul.mubr.msk.f32.vlgmr.msra.gmra.mxu1 %vm2352_vm9, %v2363_v4  ;;  %v2978_v4 = vld [vmem:[#allocation20 + $0x40] sm:$0xff] }
0x1114   : > { %4130 = vmatpush3.xpose.msk.msra.mxu1 %vm1207_vm3, %v2442_v6  ;;  %4133 = vmatprep.mubr.msk.f32.mxu1 %vm4916_vm0, %v4915_v5  ;;  %v2977_v6 = vld [vmem:[#allocation20 + $0x38] sm:$0xff] }
0x1115   : > { %4131 = vmatprep.subr.mxu1 %v4915_v5 }
0x1118   : > { %4132 = vmatpush3.xpose.msk.msra.mxu1 %vm1207_vm3, %v2440_v3  ;;  %v2979_v3 = vld [vmem:[#allocation20 + $0x48] sm:$0xff] }
0x1119   : > { %4143 = vmatprep.subr.mxu1 %v4915_v5 }
0x111b   : > { %4134 = vmatmul.mubr.msk.f32.vlgmr.msra.gmra.mxu1 %vm1207_vm3, %v2438_v7  ;;  %v2976_v7 = vld [vmem:[#allocation20 + $0x30] sm:$0xff] }
0x111c   : > { %4144 = vmatpush3.xpose.msk.msra.mxu1 %vm1207_vm3, %v2616_v8  ;;  %4147 = vmatprep.mubr.msk.f32.mxu1 %vm4916_vm0, %v4915_v5  ;;  %v2975_v8 = vld [vmem:[#allocation20 + $0x28] sm:$0xff] }
0x111d   : > { %4145 = vmatprep.subr.mxu1 %v4915_v5 }
0x1120   : > { %4146 = vmatpush3.xpose.msk.msra.mxu1 %vm1207_vm3, %v2614_v9  ;;  %v2974_v9 = vld [vmem:[#allocation20 + $0x20] sm:$0xff] }
0x1121   : > { %4150 = vmatprep.subr.mxu1 %v4915_v5 }
0x1123   : > { %4148 = vmatmul.mubr.msk.f32.vlgmr.msra.gmra.mxu1 %vm1207_vm3, %v2612_v10  ;;  %v2973_v10 = vld [vmem:[#allocation20 + $0x18] sm:$0xff] }
0x1124   : > { %4154 = vmatprep.mubr.msk.f32.mxu1 %vm4916_vm0, %v4915_v5 }
0x11d3   : > { %v5644_v12 = vpop.f32.mrf.mxu1 }
0x11d5   : > { %v4128_v13 = vpop.f32.mrf.mxu1 }
0x11d6   : > { %v2972_v13 = vld [vmem:[#allocation20 + $0x10] sm:$0xff] }
0x11db   : > { %v2515_v14 = vpop.f32.mrf.mxu1 }
0x11dc   : > { %v2516_v26 = vadd.f32 %v2515_v14, %v5618_v54  ;;  %v2971_v14 = vld [vmem:[#allocation20 + $0x8] sm:$0xff] }
0x11dd   : > { %v4135_v11 = vpop.f32.mrf.mxu1 }
0x11de   : > { %v2519_v27 = vsel %vm2352_vm9, %v2516_v26, -inf  ;;  %v2970_v11 = vld [vmem:[#allocation20] sm:$0xff] }
0x11e3   : > { %v2689_v15 = vpop.f32.mrf.mxu1 }
0x11e4   : > { %v2690_v16 = vadd.f32 %v2689_v15, %v5618_v54 }
0x11e5   : > { %v4149_v17 = vpop.f32.mrf.mxu1 }
0x11e6   : > { %v2693_v18 = vsel %vm2352_vm9, %v2690_v16, -inf }
0x11e7   : > { %2694 = vmax.xlane.f32.xlu0 %v2693_v18 }
0x11fd   : > { %2706 = vrot.lane.b32.xlu0 %v5608_v52, %s4918_s22 }
0x1201   : > { %2787 = vrot.lane.b32.xlu0 %v5584_v0, %s4919_s13 }
0x1205   : > { %2783 = vrot.lane.b32.xlu0 %v5596_v50, %s4919_s13 }
0x1270   : > { %v2695_v19 = vpop.xlane.xlu0 %2694 }
0x1271   : > { %v2696_v20 = vsub.f32 %v2690_v16, %v2695_v19 }
0x1273   : > { %v2697_v21 = vmul.f32 1.442695, %v2696_v20 }
0x1274   : > { %v2707_v22 = vpop.permute.xlu0 %2706 }
0x1275   : > { %4415 = vpow2.f32 %v2697_v21  ;;  %4151 = vmatpush3.msra.mxu1 %v2707_v22 }
0x1276   : > { %4152 = vmatprep.subr.mxu1 %v4915_v5 }
0x1277   : > { %4153 = vmatpush3.msra.mxu1 %v2705_v23 }
0x1278   : > { %4157 = vmatprep.subr.mxu1 %v4915_v5  ;;  %v2788_v32 = vpop.permute.xlu0 %2787 }
0x127c   : > { %v2784_v34 = vpop.permute.xlu0 %2783 }
0x1282   : > { %v4416_v24 = vpop.eup %4415 }
0x1283   : > { %v2699_v25 = vsel %vm2352_vm9, %v4416_v24, 0.0 }
0x1284   : > { %2700 = vadd.xlane.f32.xlu1 %v2699_v25 }
0x1295   : > { %2785 = vrot.lane.b32.xlu1 %v5588_v48, %s4919_s13 }
0x12b9   : > { %2520 = vmax.xlane.f32.xlu1 %v2519_v27 }
0x12ca   : > { %2534 = vrot.lane.b32.xlu1 %v5608_v52, %s4917_s21 }
0x12ce   : > { %2878 = vrot.lane.b32.xlu1 %v5608_v52, %s4919_s13 }
0x12d2   : > { %2876 = vrot.lane.b32.xlu1 %v5611_v53, %s4919_s13 }
0x130d   : > { %v2701_v29 = vpop.xlane.xlu1 %2700 }
0x130e   : > { %4417 = vrcp.f32 %v2701_v29 }
0x1311   : > { %v2786_v33 = vpop.permute.xlu1 %2785 }
0x131b   : > { %v4418_v30 = vpop.eup %4417 }
0x131c   : > { %v2703_v31 = vmul.f32 %v4418_v30, %v4416_v24 }
0x131e   : > { %4155 = vmatmul.mubr.msk.f32.vlgmr.msra.gmra.mxu1 %vm2352_vm9, %v2703_v31  ;;  %v3122_v31 = vld [vmem:[#allocation22 + $0xf8] sm:$0xff] }
0x131f   : > { %4158 = vmatpush3.xpose.msk.msra.mxu1 %vm1207_vm3, %v2788_v32  ;;  %4161 = vmatprep.mubr.msk.f32.mxu1 %vm4916_vm0, %v4915_v5  ;;  %v3121_v32 = vld [vmem:[#allocation22 + $0xf0] sm:$0xff] }
0x1320   : > { %4159 = vmatprep.subr.mxu1 %v4915_v5 }
0x1323   : > { %4160 = vmatpush3.xpose.msk.msra.mxu1 %vm1207_vm3, %v2786_v33  ;;  %v3120_v33 = vld [vmem:[#allocation22 + $0xe8] sm:$0xff] }
0x1324   : > { %3135 = vmatprep.subr.mxu1 %v3122_v31 }
0x1326   : > { %4162 = vmatmul.mubr.msk.f32.vlgmr.msra.gmra.mxu1 %vm1207_vm3, %v2784_v34  ;;  %v3118_v34 = vld [vmem:[#allocation22 + $0xd8] sm:$0xff] }
0x1327   : > { %3199 = vmatprep.mubr.f32.mxu1 %v4915_v5  ;;  %3136 = vmatpush1.msra.mxu1 %v3121_v32 }
0x1328   : > { %3137 = vmatprep.subr.mxu1 %v3120_v33 }
0x1342   : > { %v2521_v35 = vpop.xlane.xlu1 %2520 }
0x1343   : > { %v2522_v37 = vsub.f32 %v2516_v26, %v2521_v35  ;;  %v3117_v35 = vld [vmem:[#allocation22 + $0xd0] sm:$0xff] }
0x1345   : > { %v2523_v38 = vmul.f32 1.442695, %v2522_v37  ;;  %v3115_v37 = vld [vmem:[#allocation22 + $0xc0] sm:$0xff] }
0x1346   : > { %v2535_v36 = vpop.permute.xlu1 %2534 }
0x1347   : > { %4137 = vmatpush3.msra.mxu0 %v2535_v36  ;;  %4419 = vpow2.f32 %v2523_v38  ;;  %v3116_v36 = vld [vmem:[#allocation22 + $0xc8] sm:$0xff]  ;;  %v3114_v38 = vld [vmem:[#allocation22 + $0xb8] sm:$0xff] }
0x1348   : > { %4138 = vmatprep.subr.mxu0 %v4915_v5 }
0x134a   : > { %v2879_v55 = vpop.permute.xlu1 %2878 }
0x1354   : > { %v4420_v45 = vpop.eup %4419 }
0x1355   : > { %v2525_v46 = vsel %vm2352_vm9, %v4420_v45, 0.0 }
0x13de   : > { %v2779_v39 = vpop.f32.mrf.mxu1 }
0x13e0   : > { %v4156_v40 = vpop.f32.mrf.mxu1 }
0x13e1   : > { %v3112_v40 = vld [vmem:[#allocation22 + $0xa8] sm:$0xff] }
0x13e6   : > { %v2861_v42 = vpop.f32.mrf.mxu1 }
0x13e7   : > { %v2862_v43 = vadd.f32 %v2861_v42, %v5618_v54  ;;  %v3111_v42 = vld [vmem:[#allocation22 + $0xa0] sm:$0xff] }
0x13e8   : > { %v4163_v44 = vpop.f32.mrf.mxu1 }
0x13e9   : > { %v2865_v28 = vsel %vm2352_vm9, %v2862_v43, -inf  ;;  %v3109_v44 = vld [vmem:[#allocation22 + $0x90] sm:$0xff] }
0x13ea   : > { %2866 = vmax.xlane.f32.xlu0 %v2865_v28  ;;  %v3108_v28 = vld [vmem:[#allocation22 + $0x88] sm:$0xff] }
0x13ee   : > { %2526 = vadd.xlane.f32.xlu0 %v2525_v46  ;;  %v3106_v46 = vld [vmem:[#allocation22 + $0x78] sm:$0xff] }
0x1473   : > { %v2867_v47 = vpop.xlane.xlu0 %2866 }
0x1474   : > { %v2868_v0 = vsub.f32 %v2862_v43, %v2867_v47  ;;  %v3110_v43 = vld [vmem:[#allocation22 + $0x98] sm:$0xff]  ;;  %v3105_v47 = vld [vmem:[#allocation22 + $0x70] sm:$0xff] }
0x1476   : > { %v2869_v48 = vmul.f32 1.442695, %v2868_v0  ;;  %v3104_v0 = vld [vmem:[#allocation22 + $0x68] sm:$0xff] }
0x1477   : > { %v2527_v51 = vpop.xlane.xlu0 %2526 }
0x1478   : > { %4421 = vpow2.f32 %v2869_v48  ;;  %v3103_v48 = vld [vmem:[#allocation22 + $0x60] sm:$0xff] }
0x1479   : > { %4423 = vrcp.f32 %v2527_v51  ;;  %v3100_v51 = vld [vmem:[#allocation22 + $0x48] sm:$0xff] }
0x1485   : > { %v4422_v49 = vpop.eup %4421 }
0x1486   : > { %v2871_v50 = vsel %vm2352_vm9, %v4422_v49, 0.0  ;;  %v4424_v54 = vpop.eup %4423 }
0x1487   : > { %2872 = vadd.xlane.f32.xlu0 %v2871_v50  ;;  %v2529_v57 = vmul.f32 %v4424_v54, %v4420_v45  ;;  %v3107_v45 = vld [vmem:[#allocation22 + $0x80] sm:$0xff]  ;;  %v3101_v50 = vld [vmem:[#allocation22 + $0x50] sm:$0xff]  ;;  %v3098_v54 = vld [vmem:[#allocation22 + $0x38] sm:$0xff] }
0x149d   : > { %2532 = vrot.lane.b32.xlu0 %v5611_v53, %s4917_s21  ;;  %v2877_v53 = vpop.permute.xlu1 %2876 }
0x14a1   : > { %2960 = vrot.lane.b32.xlu0 %v2779_v39, %s4918_s22  ;;  %v3113_v39 = vld [vmem:[#allocation22 + $0xb0] sm:$0xff]  ;;  %s5869_s22 = sld [smem:[#allocation53_spill]] }
0x1510   : > { %v2873_v52 = vpop.xlane.xlu0 %2872 }
0x1511   : > { %4425 = vrcp.f32 %v2873_v52  ;;  %v3099_v52 = vld [vmem:[#allocation22 + $0x40] sm:$0xff] }
0x1514   : > { %v2533_v56 = vpop.permute.xlu0 %2532 }
0x1515   : > { %4139 = vmatpush3.msra.mxu0 %v2533_v56  ;;  %v3096_v56 = vld [vmem:[#allocation22 + $0x28] sm:$0xff] }
0x1516   : > { %4141 = vmatmul.mubr.msk.f32.vlgmr.msra.gmra.mxu0 %vm2352_vm9, %v2529_v57  ;;  %4164 = vmatprep.subr.mxu0 %v4915_v5  ;;  %v3095_v57 = vld [vmem:[#allocation22 + $0x20] sm:$0xff] }
0x1517   : > { %4165 = vmatpush3.msra.mxu0 %v2879_v55  ;;  %4168 = vmatprep.mubr.msk.f32.mxu0 %vm4916_vm0, %v4915_v5  ;;  %v3097_v55 = vld [vmem:[#allocation22 + $0x30] sm:$0xff] }
0x1518   : > { %4166 = vmatprep.subr.mxu0 %v4915_v5  ;;  %v2961_v21 = vpop.permute.xlu0 %2960 }
0x1519   : > { %4167 = vmatpush3.msra.mxu0 %v2877_v53  ;;  %v3094_v53 = vld [vmem:[#allocation22 + $0x18] sm:$0xff] }
0x151a   : > { %4171 = vmatprep.subr.mxu0 %v4915_v5 }
0x151e   : > { %v4426_v58 = vpop.eup %4425 }
0x151f   : > { %v2875_v59 = vmul.f32 %v4426_v58, %v4422_v49  ;;  %v3102_v49 = vld [vmem:[#allocation22 + $0x58] sm:$0xff]  ;;  %v3093_v58 = vld [vmem:[#allocation22 + $0x10] sm:$0xff] }
0x1521   : > { %4169 = vmatmul.mubr.msk.f32.vlgmr.msra.gmra.mxu0 %vm2352_vm9, %v2875_v59  ;;  %v3092_v59 = vld [vmem:[#allocation22 + $0x8] sm:$0xff] }
0x1522   : > { %4203 = vmatprep.mubr.msk.f32.mxu0 %vm4916_vm0, %v4915_v5  ;;  %4172 = vmatpush3.msra.mxu0 %v2985_v60  ;;  %v3091_v60 = vld [vmem:[#allocation22] sm:$0xff] }
0x1523   : > { %4173 = vmatprep.subr.mxu0 %v4915_v5 }
0x1524   : > { %4174 = vmatpush3.msra.mxu0 %v2984_v61  ;;  %v3239_v61 = vld [vmem:[#allocation23 + $0xf8] sm:$0xff] }
0x1525   : > { %4175 = vmatprep.subr.mxu0 %v4915_v5 }
0x1526   : > { %4176 = vmatpush3.msra.mxu0 %v2983_v62  ;;  %v3223_v62 = vld [vmem:[#allocation23 + $0x78] sm:$0xff] }
0x1527   : > { %4177 = vmatprep.subr.mxu0 %v4915_v5 }
0x1528   : > { %4178 = vmatpush3.msra.mxu0 %v2982_v63  ;;  %v3238_v63 = vld [vmem:[#allocation23 + $0xf0] sm:$0xff] }
0x1529   : > { %4179 = vmatprep.subr.mxu0 %v4915_v5 }
0x152a   : > { %4180 = vmatpush3.msra.mxu0 %v2981_v1  ;;  %v3222_v1 = vld [vmem:[#allocation23 + $0x70] sm:$0xff] }
0x152b   : > { %4181 = vmatprep.subr.mxu0 %v4915_v5 }
0x152c   : > { %4182 = vmatpush3.msra.mxu0 %v2980_v2  ;;  %v3237_v2 = vld [vmem:[#allocation23 + $0xe8] sm:$0xff] }
0x152d   : > { %4183 = vmatprep.subr.mxu0 %v4915_v5 }
0x152e   : > { %4184 = vmatpush3.msra.mxu0 %v2979_v3  ;;  %v3221_v3 = vld [vmem:[#allocation23 + $0x68] sm:$0xff] }
0x152f   : > { %4185 = vmatprep.subr.mxu0 %v4915_v5 }
0x1530   : > { %4186 = vmatpush3.msra.mxu0 %v2978_v4  ;;  %v3236_v4 = vld [vmem:[#allocation23 + $0xe0] sm:$0xff] }
0x1531   : > { %4187 = vmatprep.subr.mxu0 %v4915_v5 }
0x1532   : > { %4188 = vmatpush3.msra.mxu0 %v2977_v6  ;;  %v3220_v6 = vld [vmem:[#allocation23 + $0x60] sm:$0xff] }
0x1533   : > { %4189 = vmatprep.subr.mxu0 %v4915_v5 }
0x1534   : > { %4190 = vmatpush3.msra.mxu0 %v2976_v7  ;;  %v3235_v7 = vld [vmem:[#allocation23 + $0xd8] sm:$0xff] }
0x1535   : > { %4191 = vmatprep.subr.mxu0 %v4915_v5 }
0x1536   : > { %4192 = vmatpush3.msra.mxu0 %v2975_v8  ;;  %v3219_v8 = vld [vmem:[#allocation23 + $0x58] sm:$0xff] }
0x1537   : > { %4193 = vmatprep.subr.mxu0 %v4915_v5 }
0x1538   : > { %4194 = vmatpush3.msra.mxu0 %v2974_v9  ;;  %v3234_v9 = vld [vmem:[#allocation23 + $0xd0] sm:$0xff] }
0x1539   : > { %4195 = vmatprep.subr.mxu0 %v4915_v5 }
0x153a   : > { %4196 = vmatpush3.msra.mxu0 %v2973_v10  ;;  %v3218_v10 = vld [vmem:[#allocation23 + $0x50] sm:$0xff] }
0x153b   : > { %4197 = vmatprep.subr.mxu0 %v4915_v5 }
0x153c   : > { %4198 = vmatpush3.msra.mxu0 %v2972_v13  ;;  %v3233_v13 = vld [vmem:[#allocation23 + $0xc8] sm:$0xff] }
0x153d   : > { %4199 = vmatprep.subr.mxu0 %v4915_v5 }
0x153e   : > { %4200 = vmatpush3.msra.mxu0 %v2971_v14  ;;  %v3217_v14 = vld [vmem:[#allocation23 + $0x48] sm:$0xff] }
0x153f   : > { %4201 = vmatprep.subr.mxu0 %v4915_v5 }
0x1540   : > { %4202 = vmatpush3.msra.mxu0 %v2970_v11  ;;  %v3232_v11 = vld [vmem:[#allocation23 + $0xc0] sm:$0xff] }
0x1541   : > { %3795 = vmatprep.subr.mxu0 %v3239_v61 }
0x15d6   : > { %v2607_v15 = vpop.f32.mrf.mxu0 }
0x15d7   : > { %2956 = vrot.lane.b32.xlu1 %v2607_v15, %s4919_s13  ;;  %v3216_v15 = vld [vmem:[#allocation23 + $0x40] sm:$0xff]  ;;  %s3613_s13 = sshll.u32 %s5057_s23, 7  ;;  %s4803_s23 = sshll.u32 %s4920_s7, 4  ;;  %s4804_s23 = int_to_ptr.vmem [resolvable:$false] %s4803_s23 }
0x15d8   : > { %v4142_v16 = vpop.f32.mrf.mxu0  ;;  %s3332_s4 = scalar_lea.hbm %s5870_s27, %s3613_s13  ;;  %s4805_s15 = scalar_lea.vmem %s4804_s23, 256 }
0x15d9   : > { %v3231_v16 = vld [vmem:[#allocation23 + $0xb8] sm:$0xff]  ;;  %p4806_p1 = scmp.lt.s32.totalorder %s3335_s12, %s4804_s23  ;;  %p4807_p4 = scmp.lt.s32.totalorder %s4805_s15, %s4799_s6 }
0x15db   : > { %p4808_p6 = por %p4807_p4, %p4806_p1 }
0x15dd   : > { %p4809_p5 = pnand %p4808_p6, %p4802_p13 }
0x15e1   : > { %v2951_v17 = vpop.f32.mrf.mxu0 }
0x15e2   : > { %2964 = vrot.lane.b32.xlu1 %v2951_v17, %s4917_s21  ;;  %v3215_v17 = vld [vmem:[#allocation23 + $0x38] sm:$0xff] }
0x15e3   : > { %v4170_v18 = vpop.f32.mrf.mxu0 }
0x15e4   : > { %v3230_v18 = vld [vmem:[#allocation23 + $0xb0] sm:$0xff] }
0x1649   : > { %v2957_v19 = vpop.permute.xlu1 %2956 }
0x164a   : > { %v2967_v20 = vsel %vm1207_vm3, %v5644_v12, %v2957_v19  ;;  %v3214_v19 = vld [vmem:[#allocation23 + $0x30] sm:$0xff] }
0x164b   : > { %v2968_v23 = vsel %vm1878_vm5, %v2967_v20, %v2961_v21  ;;  %v3229_v20 = vld [vmem:[#allocation23 + $0xa8] sm:$0xff] }
0x164c   : > { %v3213_v21 = vld [vmem:[#allocation23 + $0x28] sm:$0xff] }
0x1654   : > { %v2965_v22 = vpop.permute.xlu1 %2964 }
0x1655   : > { %v2969_v5 = vsel %vm1880_vm6, %v2968_v23, %v2965_v22  ;;  %v3228_v22 = vld [vmem:[#allocation23 + $0xa0] sm:$0xff] }
0x1656   : > { %4204 = vmatmul.mubr.f32.vlgmr.msra.gmra.mxu0 %v2969_v5  ;;  %v3212_v23 = vld [vmem:[#allocation23 + $0x20] sm:$0xff] }
0x1657   : > { %3796 = vmatpush3.msra.mxu0 %v3223_v62 }
0x1658   : > { %3797 = vmatprep.subr.mxu0 %v3238_v63 }
0x1659   : > { %3798 = vmatpush3.msra.mxu0 %v3222_v1 }
0x165a   : > { %3799 = vmatprep.subr.mxu0 %v3237_v2 }
0x165b   : > { %3800 = vmatpush3.msra.mxu0 %v3221_v3 }
0x165c   : > { %3801 = vmatprep.subr.mxu0 %v3236_v4 }
0x165d   : > { %3802 = vmatpush3.msra.mxu0 %v3220_v6 }
0x165e   : > { %3803 = vmatprep.subr.mxu0 %v3235_v7 }
0x165f   : > { %3804 = vmatpush3.msra.mxu0 %v3219_v8 }
0x1660   : > { %3805 = vmatprep.subr.mxu0 %v3234_v9 }
0x1661   : > { %3806 = vmatpush3.msra.mxu0 %v3218_v10 }
0x1662   : > { %3807 = vmatprep.subr.mxu0 %v3233_v13 }
0x1663   : > { %3808 = vmatpush3.msra.mxu0 %v3217_v14 }
0x1664   : > { %3809 = vmatprep.subr.mxu0 %v3232_v11 }
0x1665   : > { %3810 = vmatpush3.msra.mxu0 %v3216_v15 }
0x1666   : > { %3811 = vmatprep.subr.mxu0 %v3231_v16 }
0x1667   : > { %3812 = vmatpush3.msra.mxu0 %v3215_v17 }
0x1668   : > { %3813 = vmatprep.subr.mxu0 %v3230_v18 }
0x1669   : > { %3814 = vmatpush3.msra.mxu0 %v3214_v19 }
0x166a   : > { %3815 = vmatprep.subr.mxu0 %v3229_v20 }
0x166b   : > { %3816 = vmatpush3.msra.mxu0 %v3213_v21 }
0x166c   : > { %3817 = vmatprep.subr.mxu0 %v3228_v22 }
0x166d   : > { %3818 = vmatpush3.msra.mxu0 %v3212_v23 }
0x1716   : > { %v3052_v24 = vpop.f32.mrf.mxu0 }
0x1717   : > { %v5714_v25 = vadd.f32 %v3052_v24, %v5542_v41  ;;  %v3119_v41 = vld [vmem:[#allocation22 + $0xe0] sm:$0xff] }
0x1718   : > { %v4205_v26 = vpop.f32.mrf.mxu0  ;;  %3138 = vmatpush1.msra.mxu1 %v3119_v41  ;;  %v3609_v41 = vld [vmem:[%s5789_s16] ss:$0 sm:$0xff] }
0x1719   : > { %3057 = vadd.xlane.f32.xlu0 %v5714_v25  ;;  %3139 = vmatprep.subr.mxu1 %v3118_v34 }
0x171a   : > { %3140 = vmatpush1.msra.mxu1 %v3117_v35  ;;  %v3610_v35 = vld [vmem:[%s5790_s17] ss:$0 sm:$0xff] }
0x171b   : > { %3141 = vmatprep.subr.mxu1 %v3116_v36 }
0x171c   : > { %3142 = vmatpush1.msra.mxu1 %v3115_v37 }
0x171d   : > { %3143 = vmatprep.subr.mxu1 %v3114_v38  ;;  %v3227_v38 = vld [vmem:[#allocation23 + $0x98] sm:$0xff] }
0x171e   : > { %3144 = vmatpush1.msra.mxu1 %v3113_v39  ;;  %3819 = vmatprep.subr.mxu0 %v3227_v38  ;;  %v3211_v39 = vld [vmem:[#allocation23 + $0x18] sm:$0xff] }
0x171f   : > { %3145 = vmatprep.subr.mxu1 %v3112_v40  ;;  %3820 = vmatpush3.msra.mxu0 %v3211_v39  ;;  %v3226_v40 = vld [vmem:[#allocation23 + $0x90] sm:$0xff] }
0x1720   : > { %3146 = vmatpush1.msra.mxu1 %v3111_v42  ;;  %3821 = vmatprep.subr.mxu0 %v3226_v40  ;;  %v3210_v42 = vld [vmem:[#allocation23 + $0x10] sm:$0xff] }
0x1721   : > { %3147 = vmatprep.subr.mxu1 %v3110_v43  ;;  %3822 = vmatpush3.msra.mxu0 %v3210_v42  ;;  %v3225_v43 = vld [vmem:[#allocation23 + $0x88] sm:$0xff] }
0x1722   : > { %3148 = vmatpush1.msra.mxu1 %v3109_v44  ;;  %3823 = vmatprep.subr.mxu0 %v3225_v43  ;;  %v3209_v44 = vld [vmem:[#allocation23 + $0x8] sm:$0xff] }
0x1723   : > { %3149 = vmatprep.subr.mxu1 %v3108_v28  ;;  %v3224_v28 = vld [vmem:[#allocation23 + $0x80] sm:$0xff]  ;;  %3824 = vmatpush3.msra.mxu0 %v3209_v44 }
0x1724   : > { %3150 = vmatpush1.msra.mxu1 %v3107_v45  ;;  %3825 = vmatprep.subr.mxu0 %v3224_v28  ;;  %v3125_v45 = vlaneseq }
0x1725   : > { %3151 = vmatprep.subr.mxu1 %v3106_v46 }
0x1726   : > { %3152 = vmatpush1.msra.mxu1 %v3105_v47  ;;  %v3126_v46 = vshrl.u32 %v3125_v45, 7 }
0x1727   : > { %3153 = vmatprep.subr.mxu1 %v3104_v0  ;;  %v3123_v0 = vld [vmem:[%s5868_s5] sm:$0x3] }
0x1728   : > { %3154 = vmatpush1.msra.mxu1 %v3103_v48  ;;  %v3127_v47 = vsub.s32 0, %v3126_v46  ;;  %v3131_v48 = vsub.s32 1, %v3126_v46 }
0x1729   : > { %3155 = vmatprep.subr.mxu1 %v3102_v49 }
0x172a   : > { %3156 = vmatpush1.msra.mxu1 %v3101_v50  ;;  %v3128_v49 = vrot.slane %v3123_v0, %v3127_v47  ;;  %v3132_v50 = vrot.slane %v3123_v0, %v3131_v48 }
0x172b   : > { %3157 = vmatprep.subr.mxu1 %v3100_v51 }
0x172c   : > { %3158 = vmatpush1.msra.mxu1 %v3099_v52 }
0x172d   : > { %3159 = vmatprep.subr.mxu1 %v3098_v54 }
0x172e   : > { %3160 = vmatpush1.msra.mxu1 %v3097_v55 }
0x172f   : > { %3161 = vmatprep.subr.mxu1 %v3096_v56 }
0x1730   : > { %3162 = vmatpush1.msra.mxu1 %v3095_v57 }
0x1731   : > { %3163 = vmatprep.subr.mxu1 %v3094_v53 }
0x1732   : > { %3164 = vmatpush1.msra.mxu1 %v3093_v58 }
0x1733   : > { %3165 = vmatprep.subr.mxu1 %v3092_v59 }
0x1734   : > { %3166 = vmatpush1.msra.mxu1 %v3091_v60  ;;  %v3611_v60 = vld [vmem:[%s5869_s22] ss:$0 sm:$0xff] }
0x17a2   : > { %v3058_v27 = vpop.xlane.xlu0 %3057 }
0x17a3   : > { %v3059_v29 = vmul.f32 0.0078125, %v3058_v27 }
0x17a5   : > { %v5718_v30 = vsub.f32 %v5714_v25, %v3059_v29 }
0x17a7   : > { %v3061_v12 = vmul.f32 %v5718_v30, %v5718_v30 }
0x17a9   : > { %3062 = vadd.xlane.f32.xlu1 %v3061_v12 }
0x1832   : > { %v3063_v5 = vpop.xlane.xlu1 %3062 }
0x1833   : > { %v3064_v24 = vmul.f32 0.007874016, %v3063_v5 }
0x1835   : > { %4427 = vrsqrt.f32 %v3064_v24  ;;  %vm3067_vm10 = vcmp.eq.f32.partialorder %v3064_v24, inf  ;;  %v3070_v29 = vand.u32 2147483648, %v3064_v24  ;;  %vm3069_vm11 = vcmp.eq.f32.partialorder %v3064_v24, 0.0 }
0x1842   : > { %v4428_v26 = vpop.eup %4427 }
0x1843   : > { %v3066_v27 = vmul.f32 %v4428_v26, %v3064_v24 }
0x1845   : > { %v3068_v12 = vsel %vm3067_vm10, %v3064_v24, %v3066_v27 }
0x1846   : > { %v3071_v31 = vsel %vm3069_vm11, %v3070_v29, %v3068_v12 }
0x1847   : > { %v3072_v32 = vadd.f32 1e-06, %v3071_v31 }
0x1849   : > { %4429 = vrcp.f32 %v3072_v32 }
0x1856   : > { %v4430_v33 = vpop.eup %4429 }
0x1857   : > { %v3075_v34 = vmul.f32 %v4430_v33, %v5718_v30  ;;  %v3208_v30 = vld [vmem:[#allocation23] sm:$0xff] }
0x1858   : > { %3826 = vmatpush3.msra.mxu0 %v3208_v30 }
0x1859   : > { %v3082_v36 = vmul.f32 %v3609_v41, %v3075_v34 }
0x185b   : > { %v3090_v37 = vadd.f32 %v3610_v35, %v3082_v36 }
0x185d   : > { %3200 = vmatmul.mubr.f32.vlgmr.msra.gmra.mxu1 %v3090_v37 }
0x191d   : > { %v3201_v51 = vpop.f32.mrf.mxu1 }
0x191e   : > { %v3202_v52 = vadd.f32 %v3201_v51, %v3128_v49 }
0x191f   : > { %v3203_v54 = vpop.f32.mrf.mxu1 }
0x1920   : > { %v3204_v55 = vadd.f32 %v3203_v54, %v3132_v50  ;;  %v3206_v57 = vmax.f32 %v3202_v52, 0.0 }
0x1922   : > { %v3207_v56 = vmax.f32 %v3204_v55, 0.0 }
0x1924   : > { %3304 = vmatprep.mubr.f32.mxu0 %v3207_v56 }
0x1925   : > { %3305 = vmatmul.mubr.f32.vlgmr.msra.gmra.mxu0 %v3206_v57 }
0x19e5   : > { %v3827_v53 = vpop.f32.mrf.mxu0 }
0x19e7   : > { %v3828_v58 = vpop.f32.mrf.mxu0 }
0x19e8   : > { %v3829_v59 = vadd.f32 %v3828_v58, %v3827_v53 }
0x19ea   : > { %v3310_v61 = vadd.f32 %v3829_v59, %v5714_v25 }
0x19ec   : > { %v3318_v62 = vadd.f32 %v3611_v60, %v3310_v61 }
0x19ee   : > { %3319 = vst [vmem:[%s908_s0] sm:$0xff] %v3318_v62 }
0x19ef   : > { %4812 = shalt.err (!%p4809_p5)
}
0x19f0   : > { %s4813_s18 = scalar_lea.hbm %s3332_s4, 128  ;;  %s4817_s9 = scalar_lea.hbm %s5870_s27, 256 }
0x19f1   : > { %p4814_p8 = scmp.ne.s32.totalorder %s3332_s4, %s4813_s18  ;;  %p4818_p0 = scmp.lt.s32.totalorder %s3332_s4, %s5870_s27 }
0x19f2   : > { %p4819_p11 = scmp.lt.s32.totalorder %s4817_s9, %s4813_s18 }
0x19f3   : > { %p4815_p10 = pnand %p4814_p8, %p5871_p9 }
0x19f4   : > { %p4820_p7 = por %p4819_p11, %p4818_p0 }
0x19f5   : > { %p4816_p3 = pneg %p4815_p10 }
0x19f7   : > { %p4821_p2 = pnand %p4820_p7, %p4816_p3 }
0x19f9   : > { %4824 = shalt.err (!%p4821_p2)
}
0x19fa   : > { %4258 = dma.vmem_to_hbm [thread:$0]  (%p5871_p9), %s3335_s12, 128, %s3332_s4, %s3321_s26  }
0x19fb PF: > { %s3346_s13 = sand.u32 1, %s4883_s3   ;;  %p5872_p12 = scmp.ne.s32.totalorder %s5843_s24, 0 }
0x19fc   : > { %p5873_p13 = scmp.ge.s32.totalorder %s4895_s30, 2  ;;  %s3347_s0 = scalar_lea.sflag [#allocation4], %s3346_s13 }
0x19fe   : > { %p4305_p1 = pnand %p5873_p13, %p5872_p12 }
0x1a00   : > { %p4306_p4 = pneg %p4305_p1 }
0x1a02   : > { %4878 = dma.done.wait (%p4306_p4), %s3347_s0, 128  }
0x1a03   : > { %4880 = vsyncadd (%p4306_p4), %s3347_s0, 4294967168  ;;  %p44_p6 = scmp.ge.s32.totalorder %s5201_s2, 4   ;;  %s5874_s3 = smov %s4887_s28 }
0x1a04   : > { %s5875_s28 = smov %s4891_s29  ;;  %s5876_s29 = smov %s5212_s25 }
0x1a05   : > { %s5877_s30 = smov %s5201_s2  ;;  %46 = sbr.rel (!%p44_p6) target bundleno = 33 (0x21), region = 214 }
0x1a0a   :  { %3352 = vsyncpa [#allocation3], 1 }
0x1a0b   :  { %3354 = vsyncpa [#allocation3 + $0x1], 1 }
0x1a0c   :  { %3355 = vsyncpa [#allocation6], 1 }
0x1a0d   :  { %3357 = vsyncpa [#allocation6 + $0x1], 1 }
0x1a0e   :  { %3358 = vsyncpa [#allocation9], 1 }
0x1a0f   :  { %3359 = vsyncpa [#allocation12], 1 }
0x1a10   :  { %3360 = vsyncpa [#allocation15], 1 }
0x1a11   :  { %3361 = vsyncpa [#allocation18], 1 }
0x1a12   :  { %3362 = vsyncpa [#allocation21], 1 }
0x1a13   :  { %3363 = vsyncpa [#allocation24], 1 }
0x1a14   :  { %3364 = vsyncpa [#allocation4], 1 }
0x1a15   :  { %3366 = vsyncpa [#allocation4 + $0x1], 1 }

</bundles_post_ra>
